<compile_context>
chip_gen: v6e
topology: v6e:2x2x1
jax: 0.10.0
libtpu: 0.0.40
codegen_flags: <defaults>
</compile_context>

<pallas_src>
import functools

import jax
import jax.numpy as jnp
from jax import lax
from jax.experimental import pallas as pl
from jax.experimental.pallas import tpu as pltpu

# ---- static model configuration (matches the PyTorch module) ----------------
FILTER_SIZES = [3, 3, 4, 4, 5, 5]
MAX_LENGTH = 32          # max_length (sequence length)
EMBED_DIM = 32           # embedding_dim (small, synthetic)
N_VOCAB = 100            # synthetic vocab size
BATCH = 16               # small test batch -> 2 grid steps of BLOCK_B

KMAX = max(FILTER_SIZES)             # 5   padded conv kernel size
NF = len(FILTER_SIZES)               # 6   number of conv filters == output_size
LOUT = MAX_LENGTH - KMAX + 1         # 28  last conv position any pool window touches
BLOCK_B = 8                          # batch rows per grid step (per-chip tuning knob)


# ---- Pallas kernel -----------------------------------------------------------
def _sentence_classifier_kernel(tok_ref, t2_ref, bconv_ref, mask_ref,
                                wf_ref, bf_ref, out_ref):
    # tok_ref  : (BB*L, 1)      int32  token ids for this batch block (flattened)
    # t2_ref   : (Vp, KMAX*NF)  bf16   emb_table @ packed_conv_weight (resident)
    # bconv_ref: (1, NF)        f32    Conv1d biases
    # mask_ref : (L, NF)        f32    1.0 inside filter f's MaxPool1d window
    # wf_ref   : (1, NF)        f32    fused pre_classifier+classifier weight row
    # bf_ref   : (1, 1)         f32    fused bias
    # out_ref  : (BB, 1)        f32    logits for this batch block
    tok = tok_ref[...]
    bl = tok.shape[0]
    vp = t2_ref.shape[0]

    # Exact embedding lookup + per-tap conv contribution in ONE MXU matmul:
    # P[r, k*NF + f] = tap-k contribution of filter f at flattened row r.
    onehot = jnp.where(tok == lax.broadcasted_iota(jnp.int32, (bl, vp), 1),
                       1.0, 0.0).astype(jnp.bfloat16)
    p = jnp.dot(onehot, t2_ref[...], preferred_element_type=jnp.float32)  # (BL, KMAX*NF)

    # conv[r, f] = sum_k P[r + k, k*NF + f]: align tap group k with a cheap XLU
    # sublane roll by -k (shift = bl - k), then add.
    acc = p[:, 0:NF]
    for k in range(1, KMAX):
        acc = acc + pltpu.roll(p[:, k * NF:(k + 1) * NF], shift=bl - k, axis=0)

    acc = jnp.maximum(acc + bconv_ref[...], 0.0)        # Conv1d bias + ReLU

    # Per-filter MaxPool1d window mask.  Also zeroes rows contaminated by the
    # roll wrap-around / cross-batch reads (all at t >= the pool window); applied
    # AFTER ReLU so the max stays exact (ReLU outputs are >= 0).
    bb = bl // MAX_LENGTH
    conv = acc.reshape(bb, MAX_LENGTH, NF) * mask_ref[...][None, :, :]
    pooled = jnp.max(conv, axis=1)                      # (BB, NF)

    # Fused pre_classifier -> (dropout = identity at inference) -> classifier.
    out_ref[...] = (jnp.sum(pooled * wf_ref[...], axis=-1, keepdims=True)
                    + bf_ref[...])


@functools.partial(jax.jit, static_argnames=("block_b",))
def sentence_classifier(tokens, t2, bconv, mask, wfused, bfused, *, block_b=BLOCK_B):
    # tokens: (B, L) int; t2: (V_pad, KMAX*NF) bf16 (emb table folded into conv wt).
    B, L = tokens.shape
    pad = (-B) % block_b                                # pad batch to a block multiple
    if pad:
        tokens = jnp.concatenate(
            [tokens, jnp.zeros((pad, L), tokens.dtype)], axis=0)
    bp = B + pad
    tok2d = tokens.astype(jnp.int32).reshape(bp * L, 1)  # flat, one token per sublane

    vp, c = t2.shape

    grid_spec = pltpu.PrefetchScalarGridSpec(
        num_scalar_prefetch=0,
        grid=(bp // block_b,),
        in_specs=[
            pl.BlockSpec((block_b * L, 1), lambda i: (i, 0)),  # tokens: pipelined per step
            pl.BlockSpec((vp, c), lambda i: (0, 0)),           # folded table/conv weight
            pl.BlockSpec((1, NF), lambda i: (0, 0)),           # conv bias
            pl.BlockSpec((L, NF), lambda i: (0, 0)),           # pool-window mask
            pl.BlockSpec((1, NF), lambda i: (0, 0)),           # fused linear weight
            pl.BlockSpec((1, 1), lambda i: (0, 0)),            # fused linear bias
        ],
        out_specs=pl.BlockSpec((block_b, 1), lambda i: (i, 0)),
    )

    out = pl.pallas_call(
        _sentence_classifier_kernel,
        out_shape=jax.ShapeDtypeStruct((bp, 1), jnp.float32),
        grid_spec=grid_spec,
        compiler_params=pltpu.CompilerParams(
            dimension_semantics=("parallel",)),          # 2x on v7x (2 TCs/chip)
    )(tok2d, t2, bconv, mask, wfused, bfused)
    return out[:B]


# ---- pure-JAX reference (PyTorch semantics, f32) -----------------------------
def ref_forward(emb, conv_ws, conv_bs, wpre_t, bpre, wcls_t, bcls):
    pooled = []
    for f, size in enumerate(FILTER_SIZES):
        lc = MAX_LENGTH - size + 1
        w = conv_ws[f]                                    # (E, size)
        conv = jnp.stack(
            [sum(emb[:, t + k, :] @ w[:, k] for k in range(size)) for t in range(lc)],
            axis=1) + conv_bs[f]
        conv = jnp.maximum(conv, 0.0)
        pool_k = MAX_LENGTH - size - 1                    # MaxPool1d(kernel_size=pool_k)
        pooled.append(jnp.max(conv[:, :pool_k], axis=1))  # single window (stride=kernel)
    cat = jnp.stack(pooled, axis=1)                       # (B, NF)
    h = cat @ wpre_t.T + bpre
    return h @ wcls_t.T + bcls


if __name__ == "__main__":
    key = jax.random.PRNGKey(0)
    keys = jax.random.split(key, 12)

    # Embedding table, padding_idx=0 -> row 0 is zeros.
    emb_table = 0.1 * jax.random.normal(keys[0], (N_VOCAB, EMBED_DIM), jnp.float32)
    emb_table = emb_table.at[0].set(0.0)

    # Conv1d(in=E, out=1, kernel_size=size): torch weight (1, E, size) -> (E, size).
    conv_ws, conv_bs = [], []
    for i, size in enumerate(FILTER_SIZES):
        conv_ws.append(0.1 * jax.random.normal(keys[1 + i], (EMBED_DIM, size), jnp.float32))
        conv_bs.append(jnp.float32(0.01 * (i + 1)))

    # Linear layers in torch layout: weight (out, in), bias (out,).
    wpre_t = 0.1 * jax.random.normal(keys[7], (NF, NF), jnp.float32)
    bpre = 0.05 * jax.random.normal(keys[8], (NF,), jnp.float32)
    wcls_t = 0.1 * jax.random.normal(keys[9], (1, NF), jnp.float32)
    bcls = 0.05 * jax.random.normal(keys[10], (1,), jnp.float32)

    # Pack conv filters (zero-padded to KMAX taps): W2[:, k*NF + f] = w_f[:, k].
    wconv = jnp.zeros((KMAX, EMBED_DIM, NF), jnp.float32)
    for f, size in enumerate(FILTER_SIZES):
        wconv = wconv.at[:size, :, f].set(conv_ws[f].T)
    w2 = wconv.transpose(1, 0, 2).reshape(EMBED_DIM, KMAX * NF)
    bconv = jnp.stack(conv_bs).reshape(1, NF)

    # Fold the embedding table into the packed conv weight; pad the vocab to a
    # lane-aligned contraction dim.  padding_idx=0 row is zero, so zero-padded
    # batch rows stay inert; padded vocab rows are never selected.
    v_pad = ((N_VOCAB + 127) // 128) * 128
    table_pad = jnp.zeros((v_pad, EMBED_DIM), jnp.float32).at[:N_VOCAB].set(emb_table)
    t2 = (table_pad @ w2).astype(jnp.bfloat16)            # (v_pad, KMAX*NF)

    # Per-filter MaxPool1d window mask over all L conv positions.
    pool_mask = jnp.stack(
        [(jnp.arange(MAX_LENGTH) < (MAX_LENGTH - s - 1)).astype(jnp.float32)
         for s in FILTER_SIZES], axis=1)                  # (L, NF)

    # Offline algebraic fusion of pre_classifier and classifier (no activation
    # between them; dropout is identity at inference time).
    wfused = wcls_t @ wpre_t                              # (1, NF)
    bfused = (bpre @ wcls_t.T + bcls).reshape(1, 1)       # (1, 1)

    # Input token ids (B, max_length).
    tokens = jax.random.randint(keys[11], (BATCH, MAX_LENGTH), 0, N_VOCAB)

    logits = sentence_classifier(tokens, t2, bconv, pool_mask, wfused, bfused)
    logits = jax.block_until_ready(logits)

    ref = ref_forward(emb_table[tokens], conv_ws, conv_bs, wpre_t, bpre, wcls_t, bcls)
    assert logits.shape == (BATCH, 1)
    assert jnp.allclose(logits, ref, atol=1e-2, rtol=1e-2), (logits, ref)

    print("KERNEL_OK")
</pallas_src>

<mosaic_0001>
module attributes {stable_mosaic.version = 11 : i64} {
  func.func @_sentence_classifier_kernel(%arg0: i32, %arg1: memref<256x1xi32, #tpu.memory_space<vmem>>, %arg2: memref<128x30xbf16, #tpu.memory_space<vmem>>, %arg3: memref<1x6xf32, #tpu.memory_space<vmem>>, %arg4: memref<32x6xf32, #tpu.memory_space<vmem>>, %arg5: memref<1x6xf32, #tpu.memory_space<vmem>>, %arg6: memref<1x1xf32, #tpu.memory_space<vmem>>, %arg7: memref<8x1xf32, #tpu.memory_space<vmem>>) attributes {dimension_semantics = [#tpu.dimension_semantics<parallel>], iteration_bounds = array<i64: 2>, scalar_prefetch = 0 : i64, scratch_operands = 0 : i64, tpu.core_type = #tpu.core_type<tc>, window_params = [{transform_indices = @transform_0, window_bounds = array<i64: 256, 1>}, {pipeline_mode = #tpu.pipeline_mode<synchronous>, transform_indices = @transform_1, window_bounds = array<i64: 128, 30>}, {pipeline_mode = #tpu.pipeline_mode<synchronous>, transform_indices = @transform_2, window_bounds = array<i64: 1, 6>}, {pipeline_mode = #tpu.pipeline_mode<synchronous>, transform_indices = @transform_3, window_bounds = array<i64: 32, 6>}, {pipeline_mode = #tpu.pipeline_mode<synchronous>, transform_indices = @transform_4, window_bounds = array<i64: 1, 6>}, {pipeline_mode = #tpu.pipeline_mode<synchronous>, transform_indices = @transform_5, window_bounds = array<i64: 1, 1>}, {transform_indices = @transform_6, window_bounds = array<i64: 8, 1>}]} {
    %c0 = arith.constant 0 : index
    %c0_0 = arith.constant 0 : index
    %0 = vector.load %arg1[%c0, %c0_0] : memref<256x1xi32, #tpu.memory_space<vmem>>, vector<256x1xi32>
    %1 = tpu.iota {dimensions = array<i32: 1>} : vector<256x128xi32>
    %2 = vector.broadcast %0 : vector<256x1xi32> to vector<256x128xi32>
    %3 = arith.cmpi eq, %2, %1 : vector<256x128xi32>
    %cst = arith.constant 1.000000e+00 : f32
    %cst_1 = arith.constant 0.000000e+00 : f32
    %4 = vector.broadcast %cst : f32 to vector<256x128xf32>
    %5 = vector.broadcast %cst_1 : f32 to vector<256x128xf32>
    %6 = arith.select %3, %4, %5 : vector<256x128xi1>, vector<256x128xf32>
    %7 = arith.truncf %6 : vector<256x128xf32> to vector<256x128xbf16>
    %c0_2 = arith.constant 0 : index
    %c0_3 = arith.constant 0 : index
    %8 = vector.load %arg2[%c0_2, %c0_3] : memref<128x30xbf16, #tpu.memory_space<vmem>>, vector<128x30xbf16>
    %cst_4 = arith.constant dense<0.000000e+00> : vector<256x30xf32>
    %9 = tpu.matmul %7, %8, %cst_4 {dimension_numbers = #tpu.dot_dimension_numbers<[1], [0], [0], [1], [0, 0, 1, 1], [], []>} : vector<256x128xbf16>, vector<128x30xbf16>, vector<256x30xf32> -> vector<256x30xf32>
    %10 = vector.extract_strided_slice %9 {offsets = [0, 0], sizes = [256, 6], strides = [1, 1]} : vector<256x30xf32> to vector<256x6xf32>
    %11 = vector.extract_strided_slice %9 {offsets = [0, 6], sizes = [256, 6], strides = [1, 1]} : vector<256x30xf32> to vector<256x6xf32>
    %c255_i32 = arith.constant 255 : i32
    %12 = tpu.dynamic_rotate %11 by %c255_i32 dim 0 : vector<256x6xf32>, i32 -> vector<256x6xf32>
    %13 = arith.addf %10, %12 : vector<256x6xf32>
    %14 = vector.extract_strided_slice %9 {offsets = [0, 12], sizes = [256, 6], strides = [1, 1]} : vector<256x30xf32> to vector<256x6xf32>
    %c254_i32 = arith.constant 254 : i32
    %15 = tpu.dynamic_rotate %14 by %c254_i32 dim 0 : vector<256x6xf32>, i32 -> vector<256x6xf32>
    %16 = arith.addf %13, %15 : vector<256x6xf32>
    %17 = vector.extract_strided_slice %9 {offsets = [0, 18], sizes = [256, 6], strides = [1, 1]} : vector<256x30xf32> to vector<256x6xf32>
    %c253_i32 = arith.constant 253 : i32
    %18 = tpu.dynamic_rotate %17 by %c253_i32 dim 0 : vector<256x6xf32>, i32 -> vector<256x6xf32>
    %19 = arith.addf %16, %18 : vector<256x6xf32>
    %20 = vector.extract_strided_slice %9 {offsets = [0, 24], sizes = [256, 6], strides = [1, 1]} : vector<256x30xf32> to vector<256x6xf32>
    %c252_i32 = arith.constant 252 : i32
    %21 = tpu.dynamic_rotate %20 by %c252_i32 dim 0 : vector<256x6xf32>, i32 -> vector<256x6xf32>
    %22 = arith.addf %19, %21 : vector<256x6xf32>
    %c0_5 = arith.constant 0 : index
    %c0_6 = arith.constant 0 : index
    %23 = vector.load %arg3[%c0_5, %c0_6] : memref<1x6xf32, #tpu.memory_space<vmem>>, vector<1x6xf32>
    %24 = vector.broadcast %23 : vector<1x6xf32> to vector<256x6xf32>
    %25 = arith.addf %22, %24 : vector<256x6xf32>
    %cst_7 = arith.constant 0.000000e+00 : f32
    %26 = vector.broadcast %cst_7 : f32 to vector<256x6xf32>
    %27 = arith.maximumf %25, %26 : vector<256x6xf32>
    %28 = vector.shape_cast %27 : vector<256x6xf32> to vector<8x32x6xf32>
    %c0_8 = arith.constant 0 : index
    %c0_9 = arith.constant 0 : index
    %29 = vector.load %arg4[%c0_8, %c0_9] : memref<32x6xf32, #tpu.memory_space<vmem>>, vector<32x6xf32>
    %30 = vector.shape_cast %29 : vector<32x6xf32> to vector<1x32x6xf32>
    %31 = vector.broadcast %30 : vector<1x32x6xf32> to vector<8x32x6xf32>
    %32 = arith.mulf %28, %31 : vector<8x32x6xf32>
    %cst_10 = arith.constant dense<0xFF800000> : vector<8x6xf32>
    %33 = vector.multi_reduction <maximumf>, %32, %cst_10 [1] : vector<8x32x6xf32> to vector<8x6xf32>
    %c0_11 = arith.constant 0 : index
    %c0_12 = arith.constant 0 : index
    %34 = vector.load %arg5[%c0_11, %c0_12] : memref<1x6xf32, #tpu.memory_space<vmem>>, vector<1x6xf32>
    %35 = vector.broadcast %34 : vector<1x6xf32> to vector<8x6xf32>
    %36 = arith.mulf %33, %35 : vector<8x6xf32>
    %cst_13 = arith.constant dense<0.000000e+00> : vector<8xf32>
    %37 = vector.multi_reduction <add>, %36, %cst_13 [1] : vector<8x6xf32> to vector<8xf32>
    %38 = vector.shape_cast %37 : vector<8xf32> to vector<8x1xf32>
    %c0_14 = arith.constant 0 : index
    %c0_15 = arith.constant 0 : index
    %39 = vector.load %arg6[%c0_14, %c0_15] : memref<1x1xf32, #tpu.memory_space<vmem>>, vector<1x1xf32>
    %40 = vector.broadcast %39 : vector<1x1xf32> to vector<8x1xf32>
    %41 = arith.addf %38, %40 : vector<8x1xf32>
    %c0_16 = arith.constant 0 : index
    %c0_17 = arith.constant 0 : index
    %42 = vector.load %arg7[%c0_16, %c0_17] : memref<8x1xf32, #tpu.memory_space<vmem>>, vector<8x1xf32>
    tpu.vector_store %arg7[%c0_16, %c0_17], %41 {strides = array<i32>} : memref<8x1xf32, #tpu.memory_space<vmem>>, vector<8x1xf32>,
    return
  }
  func.func @transform_0(%arg0: i32) -> (i32, i32) {
    %c0_i32 = arith.constant 0 : i32
    %c0_i32_0 = arith.constant 0 : i32
    return %arg0, %c0_i32 : i32, i32
  }
  func.func @transform_1(%arg0: i32) -> (i32, i32) {
    %c0_i32 = arith.constant 0 : i32
    %c0_i32_0 = arith.constant 0 : i32
    %c0_i32_1 = arith.constant 0 : i32
    return %c0_i32, %c0_i32_0 : i32, i32
  }
  func.func @transform_2(%arg0: i32) -> (i32, i32) {
    %c0_i32 = arith.constant 0 : i32
    %c0_i32_0 = arith.constant 0 : i32
    %c0_i32_1 = arith.constant 0 : i32
    return %c0_i32, %c0_i32_0 : i32, i32
  }
  func.func @transform_3(%arg0: i32) -> (i32, i32) {
    %c0_i32 = arith.constant 0 : i32
    %c0_i32_0 = arith.constant 0 : i32
    %c0_i32_1 = arith.constant 0 : i32
    return %c0_i32, %c0_i32_0 : i32, i32
  }
  func.func @transform_4(%arg0: i32) -> (i32, i32) {
    %c0_i32 = arith.constant 0 : i32
    %c0_i32_0 = arith.constant 0 : i32
    %c0_i32_1 = arith.constant 0 : i32
    return %c0_i32, %c0_i32_0 : i32, i32
  }
  func.func @transform_5(%arg0: i32) -> (i32, i32) {
    %c0_i32 = arith.constant 0 : i32
    %c0_i32_0 = arith.constant 0 : i32
    %c0_i32_1 = arith.constant 0 : i32
    return %c0_i32, %c0_i32_0 : i32, i32
  }
  func.func @transform_6(%arg0: i32) -> (i32, i32) {
    %c0_i32 = arith.constant 0 : i32
    %c0_i32_0 = arith.constant 0 : i32
    return %arg0, %c0_i32 : i32, i32
  }
}

</mosaic_0001>

<bundles_post_ra>
// kernel: sentence_classifier.1
= control target key start
LH: loop header
LB: loop body
LE: loop exit
PB: predicated region body
PF: predicated region fallthrough
CT: control target
= control target key end

     0   :  { %s2041_s23 = smov 0   ;;  %s3542_s0 = inlined_call_operand.vmem [shape: s32[512,1], index: 0, kind: input, shape index: {}]   ;;  %s3543_s1 = inlined_call_operand.vmem [shape: bf16[128,30], index: 1, kind: input, shape index: {}]   ;;  %s3544_s2 = inlined_call_operand.vmem [shape: f32[1,6], index: 2, kind: input, shape index: {}]   ;;  %s3545_s3 = inlined_call_operand.vmem [shape: f32[32,6], index: 3, kind: input, shape index: {}]   ;;  %s3546_s4 = inlined_call_operand.vmem [shape: f32[1,6], index: 4, kind: input, shape index: {}]   ;;  %s3547_s5 = inlined_call_operand.<no memory space> [shape: f32[1,1], index: 5, kind: input, shape index: {}]   ;;  %s3548_s6 = inlined_call_operand.vmem [shape: f32[16,1], index: 6, kind: output, shape index: {}]  }
   0x1   :  { %v11_v0 = vstv %s3547_s5 }
   0x2   :  { %12 = vst [vmem:[#allocation2] sm:$0x1] %v11_v0 }
   0x3 LB: > { %s2047_s24 = sadd.s32 4294967295, %s1995_s23   ;;  %p1823_p0 = scmp.ge.s32.totalorder %s1995_s23, 1  ;;  %s1995_s23 = sphi %s2041_s23, %s18_s23  }
   0x4   : > { %p215_p1 = scmp.lt.s32.totalorder %s1995_s23, 3 }
   0x6   : > { %p216_p2 = pnand %p1823_p0, %p215_p1 }
   0x8   : > { %219 = sbr.rel (%p216_p2) target bundleno = 898 (0x382), region = 44 }
   0xd   : > { %s1824_s25 = sshll.u32 %s2047_s24, 5  ;;  %v1997_v1 = vmov 0   ;;  %v1976_v2 = vld [vmem:[%s3543_s1 + $0x38] sm:$0xff]   ;;  %v1977_v3 = vld [vmem:[%s3543_s1 + $0x30] sm:$0xff]   ;;  %v1978_v4 = vld [vmem:[%s3543_s1 + $0x28] sm:$0xff]   ;;  %v287_v42 = vlaneseq  ;;  %s1999_s21 = smov 122  }
   0xe   : > { %1975 = vset.pattern.permute.xlu1 %v1997_v1  ;;  %1974 = vset.pattern.permute.xlu0 %v1997_v1  ;;  %p245_p3 = scmp.lt.s32.totalorder %s1824_s25, 63  ;;  %v1979_v9 = vld [vmem:[%s3543_s1 + $0x20] sm:$0xff]   ;;  %v1980_v12 = vld [vmem:[%s3543_s1 + $0x18] sm:$0xff]   ;;  %v1981_v15 = vld [vmem:[%s3543_s1 + $0x10] sm:$0xff]   ;;  %v1998_v48 = vmov 1.0|1.0  }
   0xf   : > { %1896 = vmatprep.subr.bf16.mxu0 %v1976_v2  ;;  %1944 = vmatprep.subr.bf16.mxu1 %v1976_v2  ;;  %v1982_v18 = vld [vmem:[%s3543_s1 + $0x8] sm:$0xff]   ;;  %v1983_v21 = vld [vmem:[%s3543_s1] sm:$0xff]   ;;  %v2114_v45 = vand.u32 127, %v287_v42  ;;  %s2000_s22 = smov 116   ;;  %s2002_s5 = smov 104  }
  0x10   : > { %s3765_s25 = smov (!%p245_p3, %s1824_s25), 63  ;;  %1897 = vmatpush3.bf16.msra.mxu0 %v1976_v2  ;;  %1952 = vmatpush3.bf16.msra.mxu1 %v1976_v2  ;;  %p250_p4 = scmp.lt.s32.totalorder %s2047_s24, 1 }
  0x11   : > { %s1825_s29 = sshll.u32 %s3765_s25, 3  ;;  %1898 = vmatprep.subr.bf16.mxu0 %v1977_v3  ;;  %1945 = vmatprep.subr.bf16.mxu1 %v1977_v3  ;;  %s2001_s25 = smov 110  }
  0x12   : > { %s2061_s8 = scalar_lea.vmem %s3542_s0, %s1825_s29  ;;  %s3767_s24 = smov (!%p250_p4, %s2047_s24), 1 }
  0x13   : > { %v257_v5 = vld [vmem:[%s2061_s8 + $0x10] sm:$0xff]  ;;  %v255_v6 = vld [vmem:[%s2061_s8] sm:$0xff]  ;;  %v258_v7 = vld [vmem:[%s2061_s8 + $0x18] sm:$0xff] }
  0x14   : > { %296 = vperm.xlu1 %1975, %v257_v5   ;;  %290 = vperm.xlu0 %1974, %v255_v6   ;;  %v256_v8 = vld [vmem:[%s2061_s8 + $0x8] sm:$0xff]  ;;  %v271_v11 = vld [vmem:[%s2061_s8 + $0x80] sm:$0xff]  ;;  %v274_v13 = vld [vmem:[%s2061_s8 + $0x98] sm:$0xff] }
  0x15   : > { %1899 = vmatpush3.bf16.msra.mxu0 %v1977_v3  ;;  %1953 = vmatpush3.bf16.msra.mxu1 %v1977_v3  ;;  %v272_v10 = vld [vmem:[%s2061_s8 + $0x88] sm:$0xff]  ;;  %v273_v14 = vld [vmem:[%s2061_s8 + $0x90] sm:$0xff]  ;;  %v259_v17 = vld [vmem:[%s2061_s8 + $0x20] sm:$0xff] }
  0x16   : > { %1900 = vmatprep.subr.bf16.mxu0 %v1978_v4  ;;  %1946 = vmatprep.subr.bf16.mxu1 %v1978_v4  ;;  %v260_v16 = vld [vmem:[%s2061_s8 + $0x28] sm:$0xff]  ;;  %v262_v19 = vld [vmem:[%s2061_s8 + $0x38] sm:$0xff]  ;;  %v261_v20 = vld [vmem:[%s2061_s8 + $0x30] sm:$0xff] }
  0x17   : > { %v276_v22 = vld [vmem:[%s2061_s8 + $0xa8] sm:$0xff]  ;;  %v275_v23 = vld [vmem:[%s2061_s8 + $0xa0] sm:$0xff]  ;;  %v278_v24 = vld [vmem:[%s2061_s8 + $0xb8] sm:$0xff] }
  0x18   : > { %299 = vperm.xlu1 %1975, %v258_v7   ;;  %293 = vperm.xlu0 %1974, %v256_v8   ;;  %v277_v25 = vld [vmem:[%s2061_s8 + $0xb0] sm:$0xff]  ;;  %v264_v26 = vld [vmem:[%s2061_s8 + $0x48] sm:$0xff]  ;;  %v263_v27 = vld [vmem:[%s2061_s8 + $0x40] sm:$0xff] }
  0x19   : > { %1901 = vmatpush3.bf16.msra.mxu0 %v1978_v4  ;;  %1954 = vmatpush3.bf16.msra.mxu1 %v1978_v4  ;;  %v266_v28 = vld [vmem:[%s2061_s8 + $0x58] sm:$0xff]  ;;  %v265_v29 = vld [vmem:[%s2061_s8 + $0x50] sm:$0xff]  ;;  %v280_v30 = vld [vmem:[%s2061_s8 + $0xc8] sm:$0xff] }
  0x1a   : > { %1902 = vmatprep.subr.bf16.mxu0 %v1979_v9  ;;  %1947 = vmatprep.subr.bf16.mxu1 %v1979_v9  ;;  %v279_v31 = vld [vmem:[%s2061_s8 + $0xc0] sm:$0xff]  ;;  %v282_v32 = vld [vmem:[%s2061_s8 + $0xd8] sm:$0xff]  ;;  %v281_v33 = vld [vmem:[%s2061_s8 + $0xd0] sm:$0xff] }
  0x1b   : > { %v268_v34 = vld [vmem:[%s2061_s8 + $0x68] sm:$0xff]  ;;  %v267_v35 = vld [vmem:[%s2061_s8 + $0x60] sm:$0xff]  ;;  %v270_v36 = vld [vmem:[%s2061_s8 + $0x78] sm:$0xff] }
  0x1c   : > { %341 = vperm.xlu1 %1975, %v272_v10   ;;  %338 = vperm.xlu0 %1974, %v271_v11   ;;  %v269_v37 = vld [vmem:[%s2061_s8 + $0x70] sm:$0xff]  ;;  %v284_v38 = vld [vmem:[%s2061_s8 + $0xe8] sm:$0xff]  ;;  %v283_v39 = vld [vmem:[%s2061_s8 + $0xe0] sm:$0xff] }
  0x1d   : > { %1903 = vmatpush3.bf16.msra.mxu0 %v1979_v9  ;;  %1955 = vmatpush3.bf16.msra.mxu1 %v1979_v9  ;;  %v286_v40 = vld [vmem:[%s2061_s8 + $0xf8] sm:$0xff]  ;;  %v285_v41 = vld [vmem:[%s2061_s8 + $0xf0] sm:$0xff] }
  0x1e   : > { %1904 = vmatprep.subr.bf16.mxu0 %v1980_v12  ;;  %1948 = vmatprep.subr.bf16.mxu1 %v1980_v12 }
  0x20   : > { %347 = vperm.xlu1 %1975, %v274_v13   ;;  %344 = vperm.xlu0 %1974, %v273_v14  }
  0x21   : > { %1905 = vmatpush3.bf16.msra.mxu0 %v1980_v12  ;;  %1956 = vmatpush3.bf16.msra.mxu1 %v1980_v12 }
  0x22   : > { %1906 = vmatprep.subr.bf16.mxu0 %v1981_v15  ;;  %1949 = vmatprep.subr.bf16.mxu1 %v1981_v15 }
  0x24   : > { %305 = vperm.xlu1 %1975, %v260_v16   ;;  %302 = vperm.xlu0 %1974, %v259_v17  }
  0x25   : > { %1907 = vmatpush3.bf16.msra.mxu0 %v1981_v15  ;;  %1957 = vmatpush3.bf16.msra.mxu1 %v1981_v15 }
  0x26   : > { %1908 = vmatprep.subr.bf16.mxu0 %v1982_v18  ;;  %1950 = vmatprep.subr.bf16.mxu1 %v1982_v18 }
  0x28   : > { %311 = vperm.xlu1 %1975, %v262_v19   ;;  %308 = vperm.xlu0 %1974, %v261_v20  }
  0x29   : > { %1909 = vmatpush3.bf16.msra.mxu0 %v1982_v18  ;;  %1958 = vmatpush3.bf16.msra.mxu1 %v1982_v18 }
  0x2a   : > { %1910 = vmatprep.subr.bf16.mxu0 %v1983_v21  ;;  %1951 = vmatprep.subr.bf16.mxu1 %v1983_v21 }
  0x2c   : > { %353 = vperm.xlu1 %1975, %v276_v22   ;;  %350 = vperm.xlu0 %1974, %v275_v23  }
  0x2d   : > { %1911 = vmatpush3.bf16.msra.mxu0 %v1983_v21  ;;  %1959 = vmatpush3.bf16.msra.mxu1 %v1983_v21 }
  0x30   : > { %359 = vperm.xlu1 %1975, %v278_v24   ;;  %356 = vperm.xlu0 %1974, %v277_v25  }
  0x34   : > { %317 = vperm.xlu1 %1975, %v264_v26   ;;  %314 = vperm.xlu0 %1974, %v263_v27  }
  0x38   : > { %323 = vperm.xlu1 %1975, %v266_v28   ;;  %320 = vperm.xlu0 %1974, %v265_v29  }
  0x3c   : > { %365 = vperm.xlu1 %1975, %v280_v30   ;;  %362 = vperm.xlu0 %1974, %v279_v31  }
  0x40   : > { %371 = vperm.xlu1 %1975, %v282_v32   ;;  %368 = vperm.xlu0 %1974, %v281_v33  }
  0x44   : > { %329 = vperm.xlu1 %1975, %v268_v34   ;;  %326 = vperm.xlu0 %1974, %v267_v35  }
  0x48   : > { %335 = vperm.xlu1 %1975, %v270_v36   ;;  %332 = vperm.xlu0 %1974, %v269_v37  }
  0x4c   : > { %377 = vperm.xlu1 %1975, %v284_v38   ;;  %374 = vperm.xlu0 %1974, %v283_v39  }
  0x50   : > { %383 = vperm.xlu1 %1975, %v286_v40   ;;  %380 = vperm.xlu0 %1974, %v285_v41  }
  0x8f   : > { %v297_v43 = vpop.permute.xlu1 %296  ;;  %v291_v44 = vpop.permute.xlu0 %290 }
  0x90   : > { %vm387_vm0 = vcmp.eq.s32.totalorder %v297_v43, %v2114_v45  ;;  %vm385_vm4 = vcmp.eq.s32.totalorder %v291_v44, %v2114_v45 }
  0x93   : > { %v300_v46 = vpop.permute.xlu1 %299  ;;  %v294_v47 = vpop.permute.xlu0 %293 }
  0x94   : > { %vm388_vm1 = vcmp.eq.s32.totalorder %v300_v46, %v2114_v45  ;;  %vm386_vm2 = vcmp.eq.s32.totalorder %v294_v47, %v2114_v45 }
  0x95   : > { %vm1837_vm3 = vmpackc.low %vm388_vm1, %vm387_vm0 }
  0x96   : > { %vm1835_vm5 = vmpackc.low %vm386_vm2, %vm385_vm4 }
  0x97   : > { %1912 = vmatprep.mubr.msk.bf16.mxu0 %vm1835_vm5, %v1998_v48  ;;  %v342_v49 = vpop.permute.xlu1 %341  ;;  %v339_v50 = vpop.permute.xlu0 %338 }
  0x98   : > { %1913 = vmatmul.mubr.msk.bf16.vlgmr.msra.gmra.mxu0 %vm1837_vm3, %v1998_v48  ;;  %vm401_vm6 = vcmp.eq.s32.totalorder %v339_v50, %v2114_v45  ;;  %vm402_vm7 = vcmp.eq.s32.totalorder %v342_v49, %v2114_v45 }
  0x99   : > { %vm1851_vm8 = vmpackc.low %vm402_vm7, %vm401_vm6 }
  0x9a   : > { %1928 = vmatprep.mubr.msk.bf16.mxu1 %vm1851_vm8, %v1998_v48 }
  0x9b   : > { %v348_v51 = vpop.permute.xlu1 %347  ;;  %v345_v52 = vpop.permute.xlu0 %344 }
  0x9c   : > { %vm404_vm9 = vcmp.eq.s32.totalorder %v348_v51, %v2114_v45  ;;  %vm403_vm10 = vcmp.eq.s32.totalorder %v345_v52, %v2114_v45 }
  0x9d   : > { %vm1853_vm11 = vmpackc.low %vm404_vm9, %vm403_vm10 }
  0x9e   : > { %1929 = vmatmul.mubr.msk.bf16.vlgmr.msra.gmra.mxu1 %vm1853_vm11, %v1998_v48 }
  0x9f   : > { %v306_v53 = vpop.permute.xlu1 %305  ;;  %v303_v54 = vpop.permute.xlu0 %302 }
  0xa0   : > { %vm390_vm12 = vcmp.eq.s32.totalorder %v306_v53, %v2114_v45  ;;  %vm389_vm13 = vcmp.eq.s32.totalorder %v303_v54, %v2114_v45 }
  0xa1   : > { %vm1839_vm14 = vmpackc.low %vm390_vm12, %vm389_vm13 }
  0xa2   : > { %1916 = vmatprep.mubr.msk.bf16.mxu0 %vm1839_vm14, %v1998_v48 }
  0xa3   : > { %v312_v55 = vpop.permute.xlu1 %311  ;;  %v309_v56 = vpop.permute.xlu0 %308 }
  0xa4   : > { %vm392_vm15 = vcmp.eq.s32.totalorder %v312_v55, %v2114_v45  ;;  %vm391_vm0 = vcmp.eq.s32.totalorder %v309_v56, %v2114_v45 }
  0xa5   : > { %vm1841_vm1 = vmpackc.low %vm392_vm15, %vm391_vm0 }
  0xa6   : > { %1917 = vmatmul.mubr.msk.bf16.gmra.mxu0 %vm1841_vm1, %v1998_v48 }
  0xa7   : > { %v354_v57 = vpop.permute.xlu1 %353  ;;  %v351_v58 = vpop.permute.xlu0 %350 }
  0xa8   : > { %vm406_vm2 = vcmp.eq.s32.totalorder %v354_v57, %v2114_v45  ;;  %vm405_vm3 = vcmp.eq.s32.totalorder %v351_v58, %v2114_v45 }
  0xa9   : > { %vm1855_vm4 = vmpackc.low %vm406_vm2, %vm405_vm3 }
  0xaa   : > { %1932 = vmatprep.mubr.msk.bf16.mxu1 %vm1855_vm4, %v1998_v48 }
  0xab   : > { %v360_v59 = vpop.permute.xlu1 %359  ;;  %v357_v60 = vpop.permute.xlu0 %356 }
  0xac   : > { %vm408_vm5 = vcmp.eq.s32.totalorder %v360_v59, %v2114_v45  ;;  %vm407_vm6 = vcmp.eq.s32.totalorder %v357_v60, %v2114_v45 }
  0xad   : > { %vm1857_vm7 = vmpackc.low %vm408_vm5, %vm407_vm6 }
  0xae   : > { %1933 = vmatmul.mubr.msk.bf16.gmra.mxu1 %vm1857_vm7, %v1998_v48 }
  0xaf   : > { %v318_v61 = vpop.permute.xlu1 %317  ;;  %v315_v62 = vpop.permute.xlu0 %314 }
  0xb0   : > { %vm394_vm8 = vcmp.eq.s32.totalorder %v318_v61, %v2114_v45  ;;  %vm393_vm9 = vcmp.eq.s32.totalorder %v315_v62, %v2114_v45 }
  0xb1   : > { %vm1843_vm10 = vmpackc.low %vm394_vm8, %vm393_vm9 }
  0xb2   : > { %1920 = vmatprep.mubr.msk.bf16.mxu0 %vm1843_vm10, %v1998_v48 }
  0xb3   : > { %v324_v63 = vpop.permute.xlu1 %323  ;;  %v321_v0 = vpop.permute.xlu0 %320 }
  0xb4   : > { %vm396_vm11 = vcmp.eq.s32.totalorder %v324_v63, %v2114_v45  ;;  %vm395_vm12 = vcmp.eq.s32.totalorder %v321_v0, %v2114_v45 }
  0xb5   : > { %vm1845_vm13 = vmpackc.low %vm396_vm11, %vm395_vm12 }
  0xb6   : > { %1921 = vmatmul.mubr.msk.bf16.gmra.mxu0 %vm1845_vm13, %v1998_v48 }
  0xb7   : > { %v366_v1 = vpop.permute.xlu1 %365  ;;  %v363_v2 = vpop.permute.xlu0 %362 }
  0xb8   : > { %vm410_vm14 = vcmp.eq.s32.totalorder %v366_v1, %v2114_v45  ;;  %vm409_vm15 = vcmp.eq.s32.totalorder %v363_v2, %v2114_v45 }
  0xb9   : > { %vm1859_vm0 = vmpackc.low %vm410_vm14, %vm409_vm15 }
  0xba   : > { %1936 = vmatprep.mubr.msk.bf16.mxu1 %vm1859_vm0, %v1998_v48 }
  0xbb   : > { %v372_v3 = vpop.permute.xlu1 %371  ;;  %v369_v4 = vpop.permute.xlu0 %368 }
  0xbc   : > { %vm412_vm1 = vcmp.eq.s32.totalorder %v372_v3, %v2114_v45  ;;  %vm411_vm2 = vcmp.eq.s32.totalorder %v369_v4, %v2114_v45 }
  0xbd   : > { %vm1861_vm3 = vmpackc.low %vm412_vm1, %vm411_vm2 }
  0xbe   : > { %1937 = vmatmul.mubr.msk.bf16.gmra.mxu1 %vm1861_vm3, %v1998_v48 }
  0xbf   : > { %v330_v5 = vpop.permute.xlu1 %329  ;;  %v327_v6 = vpop.permute.xlu0 %326 }
  0xc0   : > { %vm398_vm4 = vcmp.eq.s32.totalorder %v330_v5, %v2114_v45  ;;  %vm397_vm5 = vcmp.eq.s32.totalorder %v327_v6, %v2114_v45 }
  0xc1   : > { %vm1847_vm6 = vmpackc.low %vm398_vm4, %vm397_vm5  ;;  %vm1603_vm4 = vcmask 48128   ;;  %vm1732_vm5 = vcmask 1041409  }
  0xc2   : > { %1924 = vmatprep.mubr.msk.bf16.mxu0 %vm1847_vm6, %v1998_v48  ;;  %vm1735_vm6 = vcmask 1042434  }
  0xc3   : > { %v336_v7 = vpop.permute.xlu1 %335  ;;  %v333_v8 = vpop.permute.xlu0 %332 }
  0xc4   : > { %vm400_vm7 = vcmp.eq.s32.totalorder %v336_v7, %v2114_v45  ;;  %vm399_vm8 = vcmp.eq.s32.totalorder %v333_v8, %v2114_v45 }
  0xc5   : > { %vm1849_vm9 = vmpackc.low %vm400_vm7, %vm399_vm8  ;;  %vm1738_vm7 = vcmask 1043459   ;;  %vm1741_vm8 = vcmask 1044484  }
  0xc6   : > { %1925 = vmatmul.mubr.msk.bf16.gmra.mxu0 %vm1849_vm9, %v1998_v48  ;;  %vm1744_vm9 = vcmask 1045509  }
  0xc7   : > { %v378_v9 = vpop.permute.xlu1 %377  ;;  %v375_v10 = vpop.permute.xlu0 %374 }
  0xc8   : > { %vm414_vm10 = vcmp.eq.s32.totalorder %v378_v9, %v2114_v45  ;;  %vm413_vm11 = vcmp.eq.s32.totalorder %v375_v10, %v2114_v45 }
  0xc9   : > { %vm1863_vm12 = vmpackc.low %vm414_vm10, %vm413_vm11  ;;  %vm1747_vm10 = vcmask 1046534   ;;  %vm1750_vm11 = vcmask 1047559  }
  0xca   : > { %1940 = vmatprep.mubr.msk.bf16.mxu1 %vm1863_vm12, %v1998_v48  ;;  %vm1764_vm12 = vcmask 7168  }
  0xcb   : > { %v384_v11 = vpop.permute.xlu1 %383  ;;  %v381_v12 = vpop.permute.xlu0 %380 }
  0xcc   : > { %vm416_vm13 = vcmp.eq.s32.totalorder %v384_v11, %v2114_v45  ;;  %vm415_vm14 = vcmp.eq.s32.totalorder %v381_v12, %v2114_v45  ;;  %v2461_v11 = vshrl.u32 %v287_v42, 7 }
  0xcd   : > { %vm1865_vm15 = vmpackc.low %vm416_vm13, %vm415_vm14 }
  0xce   : > { %1941 = vmatmul.mubr.msk.bf16.gmra.mxu1 %vm1865_vm15, %v1998_v48  ;;  %vm852_vm0 = vcmp.lt.s32.totalorder %v2461_v11, 7  ;;  %vm1045_vm1 = vcmp.lt.s32.totalorder %v2461_v11, 6  ;;  %vm1238_vm2 = vcmp.lt.s32.totalorder %v2461_v11, 5  ;;  %vm1431_vm3 = vcmp.lt.s32.totalorder %v2461_v11, 4 }
 0x158   : > { %v2164_v13 = vpop.f32.mrf.mxu0 }
 0x159   : > { %726 = vrot.lane.b32.xlu0 %v2164_v13, %s1999_s21 }
 0x15a   : > { %v2188_v16 = vpop.f32.mrf.mxu0 }
 0x15c   : > { %v2194_v17 = vpop.f32.mrf.mxu0 }
 0x15e   : > { %v2168_v14 = vpop.f32.mrf.mxu1  ;;  %v2222_v19 = vpop.f32.mrf.mxu0 }
 0x15f   : > { %3627 = vst [vmem:[#allocation3_spill] sm:$0xff] %v2168_v14  ;;  %953 = vrot.lane.b32.xlu1 %v2168_v14, %s2000_s22  ;;  %758 = vrot.lane.b32.xlu0 %v2168_v14, %s1999_s21 }
 0x160   : > { %v2182_v15 = vpop.f32.mrf.mxu1 }
 0x161   : > { %3628 = vst [vmem:[#allocation4_spill] sm:$0xff] %v2182_v15 }
 0x162   : > { %v2200_v18 = vpop.f32.mrf.mxu1 }
 0x163   : > { %1146 = vrot.lane.b32.xlu1 %v2168_v14, %s2001_s25  ;;  %921 = vrot.lane.b32.xlu0 %v2164_v13, %s2000_s22 }
 0x164   : > { %v2228_v20 = vpop.f32.mrf.mxu1 }
 0x165   : > { %3629 = vst [vmem:[#allocation5_spill] sm:$0xff] %v2228_v20 }
 0x166   : > { %v2242_v21 = vpop.f32.mrf.mxu0 }
 0x167   : > { %1339 = vrot.lane.b32.xlu1 %v2168_v14, %s2002_s5  ;;  %1114 = vrot.lane.b32.xlu0 %v2164_v13, %s2001_s25 }
 0x168   : > { %v2258_v23 = vpop.f32.mrf.mxu0 }
 0x16a   : > { %v2274_v25 = vpop.f32.mrf.mxu0 }
 0x16b   : > { %1307 = vrot.lane.b32.xlu0 %v2164_v13, %s2002_s5  ;;  %1142 = vrot.lane.b32.xlu1 %v2182_v15, %s2001_s25 }
 0x16c   : > { %v2282_v27 = vpop.f32.mrf.mxu0 }
 0x16e   : > { %v2248_v22 = vpop.f32.mrf.mxu1 }
 0x16f   : > { %722 = vrot.lane.b32.xlu0 %v2188_v16, %s1999_s21  ;;  %1335 = vrot.lane.b32.xlu1 %v2182_v15, %s2002_s5 }
 0x170   : > { %v2264_v24 = vpop.f32.mrf.mxu1 }
 0x172   : > { %v2276_v26 = vpop.f32.mrf.mxu1 }
 0x173   : > { %728 = vrot.lane.b32.xlu1 %v2194_v17, %s1999_s21  ;;  %754 = vrot.lane.b32.xlu0 %v2182_v15, %s1999_s21 }
 0x174   : > { %v2288_v28 = vpop.f32.mrf.mxu1 }
 0x176   : > { %v2306_v29 = vpop.f32.mrf.mxu0 }
 0x177   : > { %917 = vrot.lane.b32.xlu0 %v2188_v16, %s2000_s22  ;;  %760 = vrot.lane.b32.xlu1 %v2200_v18, %s1999_s21 }
 0x178   : > { %v2356_v43 = vpop.f32.mrf.mxu0 }
 0x179   : > { %3636 = vst [vmem:[#allocation12_spill] sm:$0xff] %v2356_v43 }
 0x17a   : > { %v2408_v57 = vpop.f32.mrf.mxu0 }
 0x17b   : > { %949 = vrot.lane.b32.xlu0 %v2182_v15, %s2000_s22  ;;  %923 = vrot.lane.b32.xlu1 %v2194_v17, %s2000_s22  ;;  %3645 = vst [vmem:[#allocation21_spill] sm:$0xff] %v2408_v57 }
 0x17c   : > { %v2444_v4 = vpop.f32.mrf.mxu0 }
 0x17d   : > { %3651 = vst [vmem:[#allocation27_spill] sm:$0xff] %v2444_v4 }
 0x17e   : > { %v2314_v31 = vpop.f32.mrf.mxu1 }
 0x17f   : > { %1110 = vrot.lane.b32.xlu0 %v2188_v16, %s2001_s25  ;;  %1116 = vrot.lane.b32.xlu1 %v2194_v17, %s2001_s25  ;;  %3630 = vst [vmem:[#allocation6_spill] sm:$0xff] %v2314_v31 }
 0x180   : > { %v2366_v46 = vpop.f32.mrf.mxu1 }
 0x181   : > { %3637 = vst [vmem:[#allocation13_spill] sm:$0xff] %v2366_v46 }
 0x182   : > { %v2424_v62 = vpop.f32.mrf.mxu1 }
 0x183   : > { %1303 = vrot.lane.b32.xlu0 %v2188_v16, %s2002_s5  ;;  %1309 = vrot.lane.b32.xlu1 %v2194_v17, %s2002_s5 }
 0x184   : > { %v2432_v1 = vpop.f32.mrf.mxu1 }
 0x185   : > { %3649 = vst [vmem:[#allocation25_spill] sm:$0xff] %v2432_v1 }
 0x186   : > { %v2448_v7 = vpop.f32.mrf.mxu0 }
 0x187   : > { %955 = vrot.lane.b32.xlu0 %v2200_v18, %s2000_s22  ;;  %1341 = vrot.lane.b32.xlu1 %v2200_v18, %s2002_s5  ;;  %3652 = vst [vmem:[#allocation28_spill] sm:$0xff] %v2448_v7 }
 0x18b   : > { %1148 = vrot.lane.b32.xlu0 %v2200_v18, %s2001_s25  ;;  %724 = vrot.lane.b32.xlu1 %v2222_v19, %s1999_s21 }
 0x18e   : > { %v2458_v10 = vpop.f32.mrf.mxu1 }
 0x18f   : > { %951 = vrot.lane.b32.xlu0 %v2228_v20, %s2000_s22  ;;  %756 = vrot.lane.b32.xlu1 %v2228_v20, %s1999_s21  ;;  %3653 = vst [vmem:[#allocation29_spill] sm:$0xff] %v2458_v10 }
 0x193   : > { %1144 = vrot.lane.b32.xlu0 %v2228_v20, %s2001_s25  ;;  %919 = vrot.lane.b32.xlu1 %v2222_v19, %s2000_s22 }
 0x197   : > { %1337 = vrot.lane.b32.xlu0 %v2228_v20, %s2002_s5  ;;  %1112 = vrot.lane.b32.xlu1 %v2222_v19, %s2001_s25 }
 0x19b   : > { %1305 = vrot.lane.b32.xlu1 %v2222_v19, %s2002_s5  ;;  %734 = vrot.lane.b32.xlu0 %v2242_v21, %s1999_s21 }
 0x19f   : > { %1122 = vrot.lane.b32.xlu1 %v2242_v21, %s2001_s25  ;;  %766 = vrot.lane.b32.xlu0 %v2248_v22, %s1999_s21 }
 0x1a3   : > { %961 = vrot.lane.b32.xlu1 %v2248_v22, %s2000_s22  ;;  %929 = vrot.lane.b32.xlu0 %v2242_v21, %s2000_s22 }
 0x1a7   : > { %1315 = vrot.lane.b32.xlu1 %v2242_v21, %s2002_s5  ;;  %730 = vrot.lane.b32.xlu0 %v2258_v23, %s1999_s21 }
 0x1ab   : > { %1154 = vrot.lane.b32.xlu1 %v2248_v22, %s2001_s25  ;;  %762 = vrot.lane.b32.xlu0 %v2264_v24, %s1999_s21 }
 0x1af   : > { %1347 = vrot.lane.b32.xlu1 %v2248_v22, %s2002_s5  ;;  %925 = vrot.lane.b32.xlu0 %v2258_v23, %s2000_s22 }
 0x1b3   : > { %1118 = vrot.lane.b32.xlu1 %v2258_v23, %s2001_s25  ;;  %1349 = vrot.lane.b32.xlu0 %v2276_v26, %s2002_s5 }
 0x1b7   : > { %957 = vrot.lane.b32.xlu1 %v2264_v24, %s2000_s22  ;;  %1120 = vrot.lane.b32.xlu0 %v2282_v27, %s2001_s25 }
 0x1bb   : > { %1311 = vrot.lane.b32.xlu1 %v2258_v23, %s2002_s5  ;;  %959 = vrot.lane.b32.xlu0 %v2288_v28, %s2000_s22 }
 0x1bf   : > { %1150 = vrot.lane.b32.xlu1 %v2264_v24, %s2001_s25  ;;  %1313 = vrot.lane.b32.xlu0 %v2282_v27, %s2002_s5 }
 0x1c3   : > { %1343 = vrot.lane.b32.xlu1 %v2264_v24, %s2002_s5  ;;  %1152 = vrot.lane.b32.xlu0 %v2288_v28, %s2001_s25 }
 0x1c7   : > { %736 = vrot.lane.b32.xlu1 %v2274_v25, %s1999_s21  ;;  %1345 = vrot.lane.b32.xlu0 %v2288_v28, %s2002_s5 }
 0x1cb   : > { %768 = vrot.lane.b32.xlu1 %v2276_v26, %s1999_s21  ;;  %742 = vrot.lane.b32.xlu0 %v2306_v29, %s1999_s21  ;;  %v2312_v30 = vpop.permute.xlu0 %726 }
 0x1cf   : > { %931 = vrot.lane.b32.xlu1 %v2274_v25, %s2000_s22  ;;  %774 = vrot.lane.b32.xlu0 %v2314_v31, %s1999_s21 }
 0x1d1   : > { %v2320_v32 = vpop.permute.xlu1 %953  ;;  %v2322_v33 = vpop.permute.xlu0 %758 }
 0x1d3   : > { %1124 = vrot.lane.b32.xlu1 %v2274_v25, %s2001_s25  ;;  %937 = vrot.lane.b32.xlu0 %v2306_v29, %s2000_s22 }
 0x1d5   : > { %v2328_v34 = vpop.permute.xlu1 %1146  ;;  %v2330_v35 = vpop.permute.xlu0 %921 }
 0x1d6   : > { %3631 = vst [vmem:[#allocation7_spill] sm:$0xff] %v2328_v34  ;;  %v1015_v14 = vrot.slane %v2330_v35, 2 }
 0x1d7   : > { %963 = vrot.lane.b32.xlu1 %v2276_v26, %s2000_s22  ;;  %1130 = vrot.lane.b32.xlu0 %v2306_v29, %s2001_s25 }
 0x1d9   : > { %v2336_v36 = vpop.permute.xlu1 %1339  ;;  %v2338_v37 = vpop.permute.xlu0 %1114 }
 0x1da   : > { %3632 = vst [vmem:[#allocation8_spill] sm:$0xff] %v2336_v36  ;;  %v1208_v35 = vrot.slane %v2338_v37, 3 }
 0x1db   : > { %1317 = vrot.lane.b32.xlu1 %v2274_v25, %s2002_s5  ;;  %1323 = vrot.lane.b32.xlu0 %v2306_v29, %s2002_s5 }
 0x1dd   : > { %v2344_v38 = vpop.permute.xlu1 %1142  ;;  %v2346_v39 = vpop.permute.xlu0 %1307 }
 0x1de   : > { %3633 = vst [vmem:[#allocation9_spill] sm:$0xff] %v2344_v38 }
 0x1df   : > { %1156 = vrot.lane.b32.xlu1 %v2276_v26, %s2001_s25  ;;  %1355 = vrot.lane.b32.xlu0 %v2314_v31, %s2002_s5 }
 0x1e1   : > { %v2352_v40 = vpop.permute.xlu1 %1335  ;;  %v2354_v41 = vpop.permute.xlu0 %722 }
 0x1e2   : > { %3634 = vst [vmem:[#allocation10_spill] sm:$0xff] %v2352_v40  ;;  %3635 = vst [vmem:[#allocation11_spill] sm:$0xff] %v2354_v41  ;;  %v3556_v40 = vrot.slane %v2354_v41, 1 }
 0x1e3   : > { %732 = vrot.lane.b32.xlu1 %v2282_v27, %s1999_s21  ;;  %738 = vrot.lane.b32.xlu0 %v2356_v43, %s1999_s21 }
 0x1e5   : > { %v2362_v44 = vpop.permute.xlu1 %728  ;;  %v2364_v45 = vpop.permute.xlu0 %754 }
 0x1e7   : > { %764 = vrot.lane.b32.xlu1 %v2288_v28, %s1999_s21  ;;  %770 = vrot.lane.b32.xlu0 %v2366_v46, %s1999_s21 }
 0x1e9   : > { %v2372_v47 = vpop.permute.xlu1 %760  ;;  %v2374_v48 = vpop.permute.xlu0 %917 }
 0x1ea   : > { %3638 = vst [vmem:[#allocation14_spill] sm:$0xff] %v2372_v47  ;;  %3639 = vst [vmem:[#allocation15_spill] sm:$0xff] %v2374_v48 }
 0x1eb   : > { %927 = vrot.lane.b32.xlu1 %v2282_v27, %s2000_s22  ;;  %933 = vrot.lane.b32.xlu0 %v2356_v43, %s2000_s22 }
 0x1ed   : > { %v2380_v49 = vpop.permute.xlu1 %923  ;;  %v2382_v50 = vpop.permute.xlu0 %949 }
 0x1ee   : > { %3640 = vst [vmem:[#allocation16_spill] sm:$0xff] %v2382_v50  ;;  %v1016_v20 = vrot.slane %v2380_v49, 2 }
 0x1ef   : > { %969 = vrot.lane.b32.xlu1 %v2314_v31, %s2000_s22  ;;  %1126 = vrot.lane.b32.xlu0 %v2356_v43, %s2001_s25 }
 0x1f1   : > { %v2388_v51 = vpop.permute.xlu1 %1116  ;;  %v2390_v52 = vpop.permute.xlu0 %1110 }
 0x1f2   : > { %3641 = vst [vmem:[#allocation17_spill] sm:$0xff] %v2390_v52 }
 0x1f3   : > { %1162 = vrot.lane.b32.xlu1 %v2314_v31, %s2001_s25  ;;  %1319 = vrot.lane.b32.xlu0 %v2356_v43, %s2002_s5 }
 0x1f5   : > { %v2396_v53 = vpop.permute.xlu1 %1309  ;;  %v2398_v54 = vpop.permute.xlu0 %1303 }
 0x1f6   : > { %3642 = vst [vmem:[#allocation18_spill] sm:$0xff] %v2398_v54  ;;  %v3561_v41 = vrot.slane %v2398_v54, 4 }
 0x1f7   : > { %965 = vrot.lane.b32.xlu1 %v2366_v46, %s2000_s22  ;;  %1351 = vrot.lane.b32.xlu0 %v2366_v46, %s2002_s5 }
 0x1f9   : > { %v2404_v55 = vpop.permute.xlu1 %1341  ;;  %v2406_v56 = vpop.permute.xlu0 %955 }
 0x1fa   : > { %3643 = vst [vmem:[#allocation19_spill] sm:$0xff] %v2404_v55  ;;  %3644 = vst [vmem:[#allocation20_spill] sm:$0xff] %v2406_v56 }
 0x1fb   : > { %1158 = vrot.lane.b32.xlu1 %v2366_v46, %s2001_s25  ;;  %1132 = vrot.lane.b32.xlu0 %v2408_v57, %s2001_s25  ;;  %v820_v46 = vrot.slane %v2312_v30, 1 }
 0x1fd   : > { %v725_v58 = vpop.permute.xlu1 %724  ;;  %v2414_v59 = vpop.permute.xlu0 %1148 }
 0x1fe   : > { %3646 = vst [vmem:[#allocation22_spill] sm:$0xff] %v2414_v59  ;;  %v819_v12 = vrot.slane %v725_v58, 1 }
 0x1ff   : > { %744 = vrot.lane.b32.xlu1 %v2408_v57, %s1999_s21  ;;  %1325 = vrot.lane.b32.xlu0 %v2408_v57, %s2002_s5 }
 0x200   : > { %v882_v58 = vsel %vm852_vm0, %v819_v12, %v820_v46  ;;  %v883_v30 = vsel %vm852_vm0, %v3556_v40, %v819_v12  ;;  %v3654_v12 = vrot.slane %v2374_v48, 2 }
 0x201   : > { %v2420_v60 = vpop.permute.xlu1 %756  ;;  %v2422_v61 = vpop.permute.xlu0 %951  ;;  %v885_v15 = vadd.f32 %v883_v30, %v2188_v16  ;;  %v886_v50 = vadd.f32 %v882_v58, %v2222_v19  ;;  %v1209_v30 = vrot.slane %v2388_v51, 3 }
 0x202   : > { %3647 = vst [vmem:[#allocation23_spill] sm:$0xff] %v2422_v61  ;;  %v3655_v61 = vrot.slane %v2390_v52, 3 }
 0x203   : > { %1164 = vrot.lane.b32.xlu0 %v2424_v62, %s2001_s25  ;;  %776 = vrot.lane.b32.xlu1 %v2424_v62, %s1999_s21 }
 0x205   : > { %v920_v63 = vpop.permute.xlu1 %919  ;;  %v2430_v0 = vpop.permute.xlu0 %1144 }
 0x206   : > { %3648 = vst [vmem:[#allocation24_spill] sm:$0xff] %v2430_v0 }
 0x207   : > { %939 = vrot.lane.b32.xlu1 %v2408_v57, %s2000_s22  ;;  %967 = vrot.lane.b32.xlu0 %v2432_v1, %s2000_s22 }
 0x209   : > { %v1113_v2 = vpop.permute.xlu1 %1112  ;;  %v2438_v3 = vpop.permute.xlu0 %1337 }
 0x20a   : > { %3650 = vst [vmem:[#allocation26_spill] sm:$0xff] %v2438_v3  ;;  %v1014_v3 = vrot.slane %v920_v63, 2  ;;  %v1207_v38 = vrot.slane %v1113_v2, 3  ;;  %v821_v63 = vrot.slane %v2362_v44, 1  ;;  %v1401_v44 = vrot.slane %v2346_v39, 4 }
 0x20b   : > { %971 = vrot.lane.b32.xlu1 %v2424_v62, %s2000_s22  ;;  %1160 = vrot.lane.b32.xlu0 %v2432_v1, %s2001_s25 }
 0x20c   : > { %v1075_v2 = vsel %vm1045_vm1, %v1014_v3, %v1015_v14  ;;  %v1076_v37 = vsel %vm1045_vm1, %v3654_v12, %v1014_v3  ;;  %v1268_v48 = vsel %vm1238_vm2, %v1207_v38, %v1208_v35  ;;  %v1269_v3 = vsel %vm1238_vm2, %v3655_v61, %v1207_v38 }
 0x20d   : > { %v1306_v5 = vpop.permute.xlu1 %1305  ;;  %v2446_v6 = vpop.permute.xlu0 %734  ;;  %v1078_v16 = vadd.f32 %v1076_v37, %v885_v15  ;;  %v1079_v19 = vadd.f32 %v1075_v2, %v886_v50  ;;  %v881_v58 = vsel %vm852_vm0, %v820_v46, %v821_v63  ;;  %v1074_v50 = vsel %vm1045_vm1, %v1015_v14, %v1016_v20 }
 0x20e   : > { %v1400_v40 = vrot.slane %v1306_v5, 4  ;;  %v3566_v46 = vrot.slane %v2396_v53, 4  ;;  %v1267_v14 = vsel %vm1238_vm2, %v1208_v35, %v1209_v30 }
 0x20f   : > { %740 = vrot.lane.b32.xlu1 %v2444_v4, %s1999_s21  ;;  %750 = vrot.lane.b32.xlu0 %v2448_v7, %s1999_s21  ;;  %v1271_v12 = vadd.f32 %v1269_v3, %v1078_v16  ;;  %v1272_v15 = vadd.f32 %v1268_v48, %v1079_v19 }
 0x210   : > { %v1461_v38 = vsel %vm1431_vm3, %v1400_v40, %v1401_v44  ;;  %v1462_v61 = vsel %vm1431_vm3, %v3561_v41, %v1400_v40  ;;  %v887_v40 = vadd.f32 %v2164_v13, %v881_v58  ;;  %v2556_v13 = vld [vmem:[%s3544_s2] ss:$0 sm:$0xff] }
 0x211   : > { %v2454_v8 = vpop.permute.xlu1 %1122  ;;  %v2456_v9 = vpop.permute.xlu0 %766  ;;  %v1464_v2 = vadd.f32 %v1462_v61, %v1271_v12  ;;  %v1465_v48 = vadd.f32 %v1461_v38, %v1272_v15 }
 0x212   : > { %v1080_v19 = vadd.f32 %v1074_v50, %v887_v40 }
 0x213   : > { %772 = vrot.lane.b32.xlu1 %v2432_v1, %s1999_s21  ;;  %782 = vrot.lane.b32.xlu0 %v2458_v10, %s1999_s21  ;;  %v1503_v38 = vadd.f32 %v2556_v13, %v1464_v2  ;;  %v1504_v61 = vadd.f32 %v2556_v13, %v1465_v48 }
 0x214   : > { %v1273_v58 = vadd.f32 %v1267_v14, %v1080_v19 }
 0x215   : > { %v2467_v57 = vpop.permute.xlu1 %961  ;;  %v2469_v43 = vpop.permute.xlu0 %929  ;;  %v1535_v14 = vmax.f32 %v1503_v38, 0.0  ;;  %v1536_v19 = vmax.f32 %v1504_v61, 0.0  ;;  %v2609_v38 = vld [vmem:[%s3545_s3] sm:$0xff]  ;;  %v2614_v61 = vld [vmem:[%s3545_s3 + $0x8] sm:$0xff] }
 0x216   : > { %v3576_v52 = vrot.slane %v2467_v57, 2 }
 0x217   : > { %935 = vrot.lane.b32.xlu1 %v2444_v4, %s2000_s22  ;;  %945 = vrot.lane.b32.xlu0 %v2448_v7, %s2000_s22 }
 0x219   : > { %v2490_v42 = vpop.permute.xlu1 %1315  ;;  %v2492_v0 = vpop.permute.xlu0 %730 }
 0x21a   : > { %v3562_v39 = vrot.slane %v2492_v0, 1 }
 0x21b   : > { %1128 = vrot.lane.b32.xlu1 %v2444_v4, %s2001_s25  ;;  %1138 = vrot.lane.b32.xlu0 %v2448_v7, %s2001_s25 }
 0x21c   : > { %v880_v51 = vsel %vm852_vm0, %v821_v63, %v3562_v39  ;;  %v1460_v63 = vsel %vm1431_vm3, %v1401_v44, %v3566_v46  ;;  %v3563_v44 = vrot.slane %v2372_v47, 1 }
 0x21d   : > { %v2518_v49 = vpop.permute.xlu1 %1154  ;;  %v2520_v5 = vpop.permute.xlu0 %762  ;;  %v888_v41 = vadd.f32 %v2194_v17, %v880_v51 }
 0x21e   : > { %v3565_v35 = vrot.slane %v2520_v5, 1 }
 0x21f   : > { %1321 = vrot.lane.b32.xlu1 %v2444_v4, %s2002_s5  ;;  %977 = vrot.lane.b32.xlu0 %v2458_v10, %s2000_s22  ;;  %v3579_v4 = vrot.slane %v2414_v59, 3 }
 0x221   : > { %v2543_v37 = vpop.permute.xlu1 %1347  ;;  %v2545_v3 = vpop.permute.xlu0 %925 }
 0x222   : > { %v3564_v16 = vrot.slane %v2545_v3, 2  ;;  %v3568_v51 = vrot.slane %v2543_v37, 4 }
 0x223   : > { %1353 = vrot.lane.b32.xlu1 %v2432_v1, %s2002_s5  ;;  %1331 = vrot.lane.b32.xlu0 %v2448_v7, %s2002_s5 }
 0x224   : > { %v1073_v17 = vsel %vm1045_vm1, %v1016_v20, %v3564_v16  ;;  %v1466_v20 = vadd.f32 %v1460_v63, %v1273_v58  ;;  %v3572_v16 = vrot.slane %v2454_v8, 3 }
 0x225   : > { %v1081_v12 = vadd.f32 %v1073_v17, %v888_v41  ;;  %v1119_v15 = vpop.permute.xlu1 %1118  ;;  %v2571_v50 = vpop.permute.xlu0 %1349  ;;  %v864_v41 = vsel %vm852_vm0, %v3563_v44, %v3565_v35 }
 0x226   : > { %v1210_v40 = vrot.slane %v1119_v15, 3  ;;  %v3567_v39 = vrot.slane %v2571_v50, 4  ;;  %v2596_v15 = vpop.f32.mrf.mxu0  ;;  %v2598_v44 = vpop.f32.mrf.mxu1 }
 0x227   : > { %1363 = vrot.lane.b32.xlu1 %v2458_v10, %s2002_s5  ;;  %1170 = vrot.lane.b32.xlu0 %v2458_v10, %s2001_s25  ;;  %3656 = vst [vmem:[#allocation30_spill] sm:$0xff] %v2596_v15  ;;  %3657 = vst [vmem:[#allocation31_spill] sm:$0xff] %v2598_v44 }
 0x228   : > { %v1266_v2 = vsel %vm1238_vm2, %v1209_v30, %v1210_v40  ;;  %v2592_v48 = vsel %vm1431_vm3, %v3568_v51, %v3567_v39  ;;  %v3569_v30 = vrot.slane %v2406_v56, 2  ;;  %v1505_v39 = vadd.f32 %v2556_v13, %v1466_v20  ;;  %v2634_v54 = vpop.f32.mrf.mxu0 }
 0x229   : > { %v1274_v63 = vadd.f32 %v1266_v2, %v1081_v12  ;;  %v958_v17 = vpop.permute.xlu1 %957  ;;  %v1121_v58 = vpop.permute.xlu0 %1120  ;;  %v904_v51 = vadd.f32 %v2200_v18, %v864_v41  ;;  %v1571_v41 = vmul.f32 %v2609_v38, %v1535_v14  ;;  %v1572_v2 = vmul.f32 %v2614_v61, %v1536_v19  ;;  %3658 = vst [vmem:[#allocation32_spill] sm:$0xff] %v2634_v54 }
 0x22a   : > { %v1033_v35 = vrot.slane %v958_v17, 2  ;;  %v1211_v46 = vrot.slane %v1121_v58, 3  ;;  %v1537_v7 = vmax.f32 %v1505_v39, 0.0 }
 0x22b   : > { %1359 = vrot.lane.b32.xlu1 %v2598_v44, %s2002_s5  ;;  %746 = vrot.lane.b32.xlu0 %v2596_v15, %s1999_s21  ;;  %v1604_v19 = vsel %vm1603_vm4, %v1571_v41, -inf }
 0x22c   : > { %v1057_v12 = vsel %vm1045_vm1, %v3569_v30, %v1033_v35  ;;  %v2624_v18 = vsel %vm1238_vm2, %v1211_v46, %v3572_v16  ;;  %v2628_v20 = vsel %vm1238_vm2, %v1210_v40, %v1211_v46  ;;  %v2642_v46 = vld [vmem:[%s3545_s3 + $0x10] sm:$0xff] }
 0x22d   : > { %v1097_v17 = vadd.f32 %v1057_v12, %v904_v51  ;;  %v1312_v58 = vpop.permute.xlu1 %1311  ;;  %v960_v30 = vpop.permute.xlu0 %959  ;;  %v3659_v51 = vrot.slane %v2396_v53, 4  ;;  %v1605_v53 = vsel %vm1603_vm4, %v1572_v2, -inf }
 0x22e   : > { %v1403_v16 = vrot.slane %v1312_v58, 4  ;;  %v1034_v10 = vrot.slane %v960_v30, 2  ;;  %v1606_v41 = vmax.f32 %v1604_v19, %v1605_v53 }
 0x22f   : > { %752 = vrot.lane.b32.xlu1 %v2634_v54, %s1999_s21  ;;  %778 = vrot.lane.b32.xlu0 %v2598_v44, %s1999_s21 }
 0x230   : > { %v1459_v40 = vsel %vm1431_vm3, %v3659_v51, %v1403_v16  ;;  %v2652_v14 = vsel %vm1045_vm1, %v1034_v10, %v3576_v52  ;;  %v2656_v39 = vsel %vm1045_vm1, %v1033_v35, %v1034_v10  ;;  %v2662_v51 = vpop.f32.mrf.mxu1  ;;  %v3582_v52 = vrot.slane %v2490_v42, 4 }
 0x231   : > { %v1467_v30 = vadd.f32 %v1459_v40, %v1274_v63  ;;  %v1151_v12 = vpop.permute.xlu1 %1150  ;;  %v1314_v58 = vpop.permute.xlu0 %1313  ;;  %3660 = vst [vmem:[#allocation33_spill] sm:$0xff] %v2662_v51  ;;  %v1573_v10 = vmul.f32 %v2642_v46, %v1537_v7  ;;  %v2673_v63 = vld [vmem:[%s3545_s3 + $0x18] sm:$0xff] }
 0x232   : > { %v1226_v1 = vrot.slane %v1151_v12, 3  ;;  %v1404_v56 = vrot.slane %v1314_v58, 4  ;;  %v3584_v58 = vrot.slane %v2404_v55, 4 }
 0x233   : > { %v1506_v35 = vadd.f32 %v2556_v13, %v1467_v30  ;;  %784 = vrot.lane.b32.xlu1 %v2662_v51, %s1999_s21  ;;  %941 = vrot.lane.b32.xlu0 %v2596_v15, %s2000_s22 }
 0x234   : > { %v1250_v2 = vsel %vm1238_vm2, %v3579_v4, %v1226_v1  ;;  %v2683_v7 = vsel %vm1431_vm3, %v1404_v56, %v3582_v52  ;;  %v2687_v40 = vsel %vm1431_vm3, %v1403_v16, %v1404_v56  ;;  %v3587_v4 = vrot.slane %v2518_v49, 3 }
 0x235   : > { %v1538_v19 = vmax.f32 %v1506_v35, 0.0  ;;  %v1290_v53 = vadd.f32 %v1250_v2, %v1097_v17  ;;  %v1344_v30 = vpop.permute.xlu1 %1343  ;;  %v1153_v12 = vpop.permute.xlu0 %1152  ;;  %v1607_v52 = vsel %vm1603_vm4, %v1573_v10, -inf }
 0x236   : > { %v1419_v59 = vrot.slane %v1344_v30, 4  ;;  %v1227_v47 = vrot.slane %v1153_v12, 3  ;;  %v1608_v56 = vmax.f32 %v1606_v41, %v1607_v52 }
 0x237   : > { %v1574_v31 = vmul.f32 %v2673_v63, %v1538_v19  ;;  %947 = vrot.lane.b32.xlu1 %v2634_v54, %s2000_s22  ;;  %1134 = vrot.lane.b32.xlu0 %v2596_v15, %s2001_s25  ;;  %v3586_v19 = vrot.slane %v2446_v6, 1 }
 0x238   : > { %v1443_v16 = vsel %vm1431_vm3, %v3584_v58, %v1419_v59  ;;  %v2705_v17 = vsel %vm1238_vm2, %v1227_v47, %v3587_v4  ;;  %v2709_v10 = vsel %vm1238_vm2, %v1226_v1, %v1227_v47  ;;  %v3662_v47 = vrot.slane %v2543_v37, 4 }
 0x239   : > { %v1609_v52 = vsel %vm1603_vm4, %v1574_v31, -inf  ;;  %v2714_v35 = vadd.f32 %v1443_v16, %v1290_v53  ;;  %v2716_v41 = vpop.permute.xlu1 %736  ;;  %v1346_v2 = vpop.permute.xlu0 %1345 }
 0x23a   : > { %v2719_v30 = vmax.f32 %v1608_v56, %v1609_v52  ;;  %v3585_v12 = vrot.slane %v2716_v41, 1  ;;  %v1420_v58 = vrot.slane %v1346_v2, 4  ;;  %v2746_v52 = vpop.f32.mrf.mxu0  ;;  %v840_v2 = vrot.slane %v2456_v9, 1 }
 0x23b   : > { %3661 = vst [vmem:[#allocation34_spill] sm:$0xff] %v2714_v35  ;;  %1172 = vrot.lane.b32.xlu1 %v2662_v51, %s2001_s25  ;;  %973 = vrot.lane.b32.xlu0 %v2598_v44, %s2000_s22  ;;  %3663 = vst [vmem:[#allocation35_spill] sm:$0xff] %v2746_v52 }
 0x23c   : > { %v877_v31 = vsel %vm852_vm0, %v3586_v19, %v3585_v12  ;;  %v2734_v1 = vsel %vm1431_vm3, %v1420_v58, %v3662_v47  ;;  %v2738_v53 = vsel %vm1431_vm3, %v1419_v59, %v1420_v58  ;;  %v2760_v12 = vpop.f32.mrf.mxu1  ;;  %v3591_v19 = vrot.slane %v2469_v43, 2 }
 0x23d   : > { %v2742_v56 = vpop.permute.xlu1 %768  ;;  %v2744_v16 = vpop.permute.xlu0 %742  ;;  %3664 = vst [vmem:[#allocation36_spill] sm:$0xff] %v2760_v12 }
 0x23e   : > { %v841_v37 = vrot.slane %v2742_v56, 1  ;;  %v891_v56 = vadd.f32 %v2242_v21, %v877_v31  ;;  %v3665_v31 = vrot.slane %v2454_v8, 3  ;;  %v3666_v8 = vrot.slane %v2467_v57, 2 }
 0x23f   : > { %748 = vrot.lane.b32.xlu1 %v2746_v52, %s1999_s21  ;;  %1327 = vrot.lane.b32.xlu0 %v2596_v15, %s2002_s5  ;;  %v3667_v57 = vrot.slane %v2490_v42, 4  ;;  %v3669_v42 = vrot.slane %v2518_v49, 3  ;;  %v3670_v49 = vrot.slane %v2446_v6, 1 }
 0x240   : > { %v861_v59 = vsel %vm852_vm0, %v840_v2, %v841_v37 }
 0x241   : > { %v2756_v58 = vpop.permute.xlu1 %931  ;;  %v2758_v47 = vpop.permute.xlu0 %774  ;;  %v907_v36 = vadd.f32 %v2248_v22, %v861_v59 }
 0x242   : > { %v3590_v9 = vrot.slane %v2756_v58, 2 }
 0x243   : > { %780 = vrot.lane.b32.xlu1 %v2760_v12, %s1999_s21  ;;  %1166 = vrot.lane.b32.xlu0 %v2598_v44, %s2001_s25 }
 0x244   : > { %v1070_v4 = vsel %vm1045_vm1, %v3591_v19, %v3590_v9 }
 0x245   : > { %v1084_v15 = vadd.f32 %v1070_v4, %v891_v56  ;;  %v2775_v35 = vpop.permute.xlu1 %1124  ;;  %v2777_v55 = vpop.permute.xlu0 %937 }
 0x246   : > { %v3594_v21 = vrot.slane %v2775_v35, 3 }
 0x247   : > { %943 = vrot.lane.b32.xlu1 %v2746_v52, %s2000_s22  ;;  %1140 = vrot.lane.b32.xlu0 %v2634_v54, %s2001_s25 }
 0x248   : > { %v1263_v9 = vsel %vm1238_vm2, %v3665_v31, %v3594_v21 }
 0x249   : > { %v1277_v4 = vadd.f32 %v1263_v9, %v1084_v15  ;;  %v2790_v56 = vpop.permute.xlu1 %963  ;;  %v2792_v19 = vpop.permute.xlu0 %1130 }
 0x24a   : > { %v3595_v44 = vrot.slane %v2790_v56, 2 }
 0x24b   : > { %1136 = vrot.lane.b32.xlu1 %v2746_v52, %s2001_s25  ;;  %979 = vrot.lane.b32.xlu0 %v2662_v51, %s2000_s22 }
 0x24c   : > { %v1054_v31 = vsel %vm1045_vm1, %v3666_v8, %v3595_v44 }
 0x24d   : > { %v1100_v15 = vadd.f32 %v1054_v31, %v907_v36  ;;  %v2806_v9 = vpop.permute.xlu1 %1317  ;;  %v2808_v21 = vpop.permute.xlu0 %1323 }
 0x24e   : > { %v3596_v22 = vrot.slane %v2806_v9, 4 }
 0x24f   : > { %975 = vrot.lane.b32.xlu1 %v2760_v12, %s2000_s22  ;;  %1333 = vrot.lane.b32.xlu0 %v2634_v54, %s2002_s5 }
 0x250   : > { %v1456_v59 = vsel %vm1431_vm3, %v3667_v57, %v3596_v22 }
 0x251   : > { %v1470_v36 = vadd.f32 %v1456_v59, %v1277_v4  ;;  %v2821_v8 = vpop.permute.xlu1 %1156  ;;  %v2823_v31 = vpop.permute.xlu0 %1355 }
 0x252   : > { %3668 = vst [vmem:[#allocation37_spill] sm:$0xff] %v2823_v31  ;;  %v3599_v44 = vrot.slane %v2821_v8, 3 }
 0x253   : > { %1329 = vrot.lane.b32.xlu1 %v2746_v52, %s2002_s5  ;;  %1361 = vrot.lane.b32.xlu0 %v2760_v12, %s2002_s5  ;;  %v1509_v52 = vadd.f32 %v2556_v13, %v1470_v36 }
 0x254   : > { %v1247_v57 = vsel %vm1238_vm2, %v3669_v42, %v3599_v44  ;;  %v3671_v44 = vrot.slane %v2492_v0, 1  ;;  %v3673_v0 = vrot.slane %v2520_v5, 1 }
 0x255   : > { %v1293_v4 = vadd.f32 %v1247_v57, %v1100_v15  ;;  %v733_v59 = vpop.permute.xlu1 %732  ;;  %v2836_v22 = vpop.permute.xlu0 %738  ;;  %v3672_v57 = vrot.slane %v2716_v41, 1 }
 0x256   : > { %v823_v54 = vrot.slane %v733_v59, 1  ;;  %v3600_v31 = vrot.slane %v2836_v22, 1 }
 0x257   : > { %v1486_v34 = vadd.f32 %v2592_v48, %v1293_v4  ;;  %1168 = vrot.lane.b32.xlu1 %v2760_v12, %s2001_s25  ;;  %1357 = vrot.lane.b32.xlu0 %v2424_v62, %s2002_s5 }
 0x258   : > { %v878_v42 = vsel %vm852_vm0, %v823_v54, %v3670_v49  ;;  %v879_v15 = vsel %vm852_vm0, %v3671_v44, %v823_v54  ;;  %v876_v48 = vsel %vm852_vm0, %v3672_v57, %v3600_v31 }
 0x259   : > { %v765_v4 = vpop.permute.xlu1 %764  ;;  %v2858_v6 = vpop.permute.xlu0 %770 }
 0x25a   : > { %v839_v59 = vrot.slane %v765_v4, 1  ;;  %v3617_v49 = vrot.slane %v2858_v6, 1 }
 0x25b   : > { %1365 = vrot.lane.b32.xlu1 %v2662_v51, %s2002_s5  ;;  %s1826_s5 = sshll.u32 %s3767_s24, 3 }
 0x25c   : > { %v862_v54 = vsel %vm852_vm0, %v839_v59, %v840_v2  ;;  %v863_v44 = vsel %vm852_vm0, %v3673_v0, %v839_v59  ;;  %v860_v41 = vsel %vm852_vm0, %v841_v37, %v3617_v49  ;;  %v1525_v2 = vadd.f32 %v2556_v13, %v1486_v34  ;;  %s253_s28 = scalar_lea.vmem %s3548_s6, %s1826_s5 }
 0x25d   : > { %v905_v57 = vadd.f32 %v863_v44, %v2264_v24  ;;  %v906_v4 = vadd.f32 %v862_v54, %v2288_v28  ;;  %v928_v31 = vpop.permute.xlu1 %927  ;;  %v2875_v12 = vpop.permute.xlu0 %933  ;;  %v889_v59 = vadd.f32 %v879_v15, %v2258_v23  ;;  %v890_v0 = vadd.f32 %v878_v42, %v2282_v27 }
 0x25e   : > { %v1018_v5 = vrot.slane %v928_v31, 2  ;;  %v3615_v51 = vrot.slane %v2875_v12, 2  ;;  %v892_v28 = vadd.f32 %v2274_v25, %v876_v48  ;;  %v3674_v54 = vrot.slane %v2469_v43, 2 }
 0x25f   : > { %v1098_v37 = vadd.f32 %v2656_v39, %v905_v57  ;;  %v1099_v24 = vadd.f32 %v2652_v14, %v906_v4  ;;  %v3675_v34 = vrot.slane %v2545_v3, 2  ;;  %v3676_v23 = vrot.slane %v2756_v58, 2 }
 0x260   : > { %v1071_v36 = vsel %vm1045_vm1, %v1018_v5, %v3674_v54 }
 0x261   : > { %v1072_v31 = vsel %vm1045_vm1, %v3675_v34, %v1018_v5  ;;  %v1069_v27 = vsel %vm1045_vm1, %v3676_v23, %v3615_v51  ;;  %v1291_v14 = vadd.f32 %v2709_v10, %v1098_v37  ;;  %v1292_v25 = vadd.f32 %v2705_v17, %v1099_v24  ;;  %v2901_v42 = vpop.permute.xlu1 %969  ;;  %v2903_v15 = vpop.permute.xlu0 %1126 }
 0x262   : > { %v1082_v43 = vadd.f32 %v1072_v31, %v889_v59  ;;  %v1083_v39 = vadd.f32 %v1071_v36, %v890_v0  ;;  %v1085_v3 = vadd.f32 %v1069_v27, %v892_v28  ;;  %v3613_v48 = vrot.slane %v2903_v15, 3 }
 0x263   : > { %v1484_v44 = vadd.f32 %v2738_v53, %v1291_v14  ;;  %v1485_v58 = vadd.f32 %v2734_v1, %v1292_v25  ;;  %v1541_v10 = vmax.f32 %v1509_v52, 0.0  ;;  %v1557_v5 = vmax.f32 %v1525_v2, 0.0 }
 0x264   : > { %v1275_v57 = vadd.f32 %v2628_v20, %v1082_v43  ;;  %v1276_v4 = vadd.f32 %v2624_v18, %v1083_v39  ;;  %v3677_v17 = vrot.slane %v2775_v35, 3  ;;  %v1611_v36 = vrot.slane %v2719_v30, 4 }
 0x265   : > { %v1523_v0 = vadd.f32 %v2556_v13, %v1484_v44  ;;  %v1524_v37 = vadd.f32 %v2556_v13, %v1485_v58  ;;  %v2920_v20 = vpop.permute.xlu1 %1162  ;;  %v2922_v18 = vpop.permute.xlu0 %1319  ;;  %v1577_v34 = vmul.f32 %v2642_v46, %v1541_v10 }
 0x266   : > { %v1262_v59 = vsel %vm1238_vm2, %v3677_v17, %v3613_v48  ;;  %v1468_v53 = vadd.f32 %v2687_v40, %v1275_v57  ;;  %v1469_v1 = vadd.f32 %v2683_v7, %v1276_v4  ;;  %v3610_v2 = vrot.slane %v2922_v18, 4 }
 0x267   : > { %v1278_v52 = vadd.f32 %v1262_v59, %v1085_v3  ;;  %v1555_v24 = vmax.f32 %v1523_v0, 0.0  ;;  %v1556_v35 = vmax.f32 %v1524_v37, 0.0  ;;  %v1593_v40 = vmul.f32 %v2642_v46, %v1557_v5 }
 0x268   : > { %v1507_v28 = vadd.f32 %v2556_v13, %v1468_v53  ;;  %v1508_v54 = vadd.f32 %v2556_v13, %v1469_v1  ;;  %v3678_v7 = vrot.slane %v2806_v9, 4  ;;  %v908_v3 = vadd.f32 %v2276_v26, %v860_v41 }
 0x269   : > { %v1591_v23 = vmul.f32 %v2609_v38, %v1555_v24  ;;  %v1592_v27 = vmul.f32 %v2614_v61, %v1556_v35  ;;  %v2938_v43 = vpop.permute.xlu1 %965  ;;  %v2940_v39 = vpop.permute.xlu0 %1351  ;;  %v3679_v59 = vrot.slane %v2790_v56, 2  ;;  %v3680_v41 = vrot.slane %v2571_v50, 4 }
 0x26a   : > { %v1455_v31 = vsel %vm1431_vm3, %v3678_v7, %v3610_v2  ;;  %v1539_v14 = vmax.f32 %v1507_v28, 0.0  ;;  %v1540_v25 = vmax.f32 %v1508_v54, 0.0  ;;  %v1037_v58 = vrot.slane %v2938_v43, 2 }
 0x26b   : > { %v1471_v44 = vadd.f32 %v1455_v31, %v1278_v52  ;;  %v3608_v9 = vrot.slane %v2940_v39, 4  ;;  %v1669_v57 = vsel %vm1603_vm4, %v1591_v23, -inf  ;;  %v1670_v4 = vsel %vm1603_vm4, %v1592_v27, -inf }
 0x26c   : > { %v1575_v10 = vmul.f32 %v2609_v38, %v1539_v14  ;;  %v1576_v5 = vmul.f32 %v2614_v61, %v1540_v25  ;;  %v1053_v26 = vsel %vm1045_vm1, %v3679_v59, %v1037_v58  ;;  %v1671_v37 = vmax.f32 %v1669_v57, %v1670_v4 }
 0x26d   : > { %v1510_v17 = vadd.f32 %v2556_v13, %v1471_v44  ;;  %v1439_v0 = vsel %vm1431_vm3, %v3680_v41, %v3608_v9  ;;  %v1672_v53 = vsel %vm1603_vm4, %v1593_v40, -inf  ;;  %v1101_v24 = vadd.f32 %v1053_v26, %v908_v3  ;;  %v2965_v35 = vpop.permute.xlu1 %1158  ;;  %v2967_v56 = vpop.permute.xlu0 %1132 }
 0x26e   : > { %v1617_v1 = vsel %vm1603_vm4, %v1575_v10, -inf  ;;  %v1618_v52 = vsel %vm1603_vm4, %v1576_v5, -inf  ;;  %v1230_v7 = vrot.slane %v2965_v35, 3  ;;  %v1673_v50 = vmax.f32 %v1671_v37, %v1672_v53 }
 0x26f   : > { %v1619_v28 = vmax.f32 %v1617_v1, %v1618_v52  ;;  %v1542_v54 = vmax.f32 %v1510_v17, 0.0  ;;  %v1612_v31 = vmax.f32 %v2719_v30, %v1611_v36  ;;  %v3614_v23 = vrot.slane %v2792_v19, 3 }
 0x270   : > { %v1620_v40 = vsel %vm1603_vm4, %v1577_v34, -inf  ;;  %v3605_v27 = vrot.slane %v2967_v56, 3  ;;  %v3681_v3 = vrot.slane %v2821_v8, 3  ;;  %v3621_v57 = vrot.slane %v2744_v16, 1 }
 0x271   : > { %v1621_v14 = vmax.f32 %v1619_v28, %v1620_v40  ;;  %v1578_v25 = vmul.f32 %v2673_v63, %v1542_v54  ;;  %v2988_v36 = vpop.permute.xlu1 %744  ;;  %v2990_v34 = vpop.permute.xlu0 %1325  ;;  %v3611_v10 = vrot.slane %v2808_v21, 4  ;;  %v1613_v59 = vrot.slane %v1612_v31, 2 }
 0x272   : > { %v1246_v44 = vsel %vm1238_vm2, %v3681_v3, %v1230_v7  ;;  %v1259_v30 = vsel %vm1238_vm2, %v3614_v23, %v3605_v27  ;;  %v3607_v5 = vrot.slane %v2988_v36, 1  ;;  %v3604_v17 = vrot.slane %v2990_v34, 4  ;;  %v3684_v23 = vld [vmem:[#allocation6_spill] sm:$0xff] }
 0x273   : > { %v1294_v4 = vadd.f32 %v1246_v44, %v1101_v24  ;;  %v1622_v8 = vsel %vm1603_vm4, %v1578_v25, -inf  ;;  %v3620_v28 = vrot.slane %v2758_v47, 1  ;;  %v1232_v54 = vrot.slane %v2920_v20, 3 }
 0x274   : > { %v1623_v26 = vmax.f32 %v1621_v14, %v1622_v8  ;;  %v873_v37 = vsel %vm852_vm0, %v3621_v57, %v3607_v5  ;;  %v1452_v53 = vsel %vm1431_vm3, %v3611_v10, %v3604_v17  ;;  %v1614_v25 = vmax.f32 %v1612_v31, %v1613_v59 }
 0x275   : > { %v1487_v41 = vadd.f32 %v1439_v0, %v1294_v4  ;;  %v3009_v24 = vpop.permute.xlu1 %776  ;;  %v3011_v0 = vpop.permute.xlu0 %1164  ;;  %v1031_v4 = vrot.slane %v2320_v32, 2  ;;  %v836_v8 = vrot.slane %v2322_v33, 1  ;;  %v3618_v31 = vrot.slane %v2364_v45, 1 }
 0x276   : > { %v1624_v1 = vrot.slane %v1623_v26, 4  ;;  %v3606_v40 = vrot.slane %v3009_v24, 1  ;;  %v3609_v14 = vrot.slane %v3011_v0, 3  ;;  %v835_v59 = vrot.slane %v2420_v60, 1 }
 0x277   : > { %v1526_v52 = vadd.f32 %v2556_v13, %v1487_v41  ;;  %v1039_v17 = vrot.slane %v2901_v42, 2  ;;  %v1615_v5 = vrot.slane %v1614_v25, 1  ;;  %v895_v2 = vadd.f32 %v2306_v29, %v873_v37  ;;  %v3682_v29 = vld [vmem:[#allocation7_spill] sm:$0xff]  ;;  %v3683_v37 = vld [vmem:[#allocation8_spill] sm:$0xff] }
 0x278   : > { %v1625_v3 = vmax.f32 %v1623_v26, %v1624_v1  ;;  %v857_v41 = vsel %vm852_vm0, %v3620_v28, %v3606_v40  ;;  %v1243_v20 = vsel %vm1238_vm2, %v1232_v54, %v3609_v14  ;;  %v867_v43 = vsel %vm852_vm0, %v3618_v31, %v835_v59  ;;  %v3696_v28 = vld [vmem:[#allocation20_spill] sm:$0xff] }
 0x279   : > { %v1558_v44 = vmax.f32 %v1526_v52, 0.0  ;;  %v3032_v33 = vpop.permute.xlu1 %939  ;;  %v968_v1 = vpop.permute.xlu0 %967  ;;  %v3616_v52 = vrot.slane %v2777_v55, 2  ;;  %v1616_v48 = vmax.f32 %v1614_v25, %v1615_v5  ;;  %v911_v51 = vadd.f32 %v3684_v23, %v857_v41  ;;  %v3086_v23 = vld [vmem:[%s3546_s4] ss:$0 sm:$0xff]  ;;  %v3689_v41 = vld [vmem:[#allocation16_spill] sm:$0xff] }
 0x27a   : > { %v1626_v26 = vrot.slane %v1625_v3, 2  ;;  %v3612_v27 = vrot.slane %v3032_v33, 2  ;;  %v1038_v40 = vrot.slane %v968_v1, 2  ;;  %3687 = vst [vmem:[#allocation7_spill] sm:$0xff] %v3086_v23  ;;  %v3624_v35 = vrot.slane %v3689_v41, 2 }
 0x27b   : > { %v1594_v32 = vmul.f32 %v2673_v63, %v1558_v44 }
 0x27c   : > { %v1627_v9 = vmax.f32 %v1625_v3, %v1626_v26  ;;  %v1066_v44 = vsel %vm1045_vm1, %v3616_v52, %v3612_v27  ;;  %v3049_v42 = vsel %vm1045_vm1, %v1038_v40, %v1039_v17  ;;  %v3055_v3 = vsel %vm1045_vm1, %v1037_v58, %v1038_v40 }
 0x27d   : > { %v1674_v14 = vsel %vm1603_vm4, %v1594_v32, -inf  ;;  %v1088_v32 = vadd.f32 %v1066_v44, %v895_v2  ;;  %v3059_v1 = vpop.permute.xlu1 %971  ;;  %v1161_v10 = vpop.permute.xlu0 %1160  ;;  %v866_v27 = vsel %vm852_vm0, %v835_v59, %v836_v8  ;;  %v3685_v2 = vld [vmem:[#allocation14_spill] sm:$0xff] }
 0x27e   : > { %v3039_v60 = vmax.f32 %v1673_v50, %v1674_v14  ;;  %v1224_v50 = vrot.slane %v3682_v29, 3  ;;  %v1628_v26 = vrot.slane %v1627_v9, 1  ;;  %v3619_v58 = vrot.slane %v3059_v1, 2 }
 0x27f   : > { %v1231_v40 = vrot.slane %v1161_v10, 3  ;;  %v1281_v52 = vadd.f32 %v1259_v30, %v1088_v32  ;;  %v3686_v44 = vrot.slane %v3685_v2, 1  ;;  %v3688_v30 = vld [vmem:[#allocation23_spill] sm:$0xff]  ;;  %v3692_v2 = vld [vmem:[#allocation24_spill] sm:$0xff] }
 0x280   : > { %v1629_v29 = vmax.f32 %v1627_v9, %v1628_v26  ;;  %v1050_v49 = vsel %vm1045_vm1, %v1039_v17, %v3619_v58  ;;  %v1030_v10 = vrot.slane %v3688_v30, 2  ;;  %v3690_v26 = vld [vmem:[#allocation4_spill] sm:$0xff]  ;;  %v3695_v30 = vld [vmem:[#allocation3_spill] sm:$0xff] }
 0x281   : > { %v865_v14 = vsel %vm852_vm0, %v836_v8, %v3686_v44  ;;  %v1244_v59 = vsel %vm1238_vm2, %v1231_v40, %v1232_v54  ;;  %v1245_v9 = vsel %vm1238_vm2, %v1230_v7, %v1231_v40  ;;  %v3089_v5 = vadd.f32 %v1452_v53, %v1281_v52  ;;  %v741_v8 = vpop.permute.xlu1 %740  ;;  %v3091_v17 = vpop.permute.xlu0 %750  ;;  %v3691_v7 = vld [vmem:[#allocation5_spill] sm:$0xff] }
 0x282   : > { %v1104_v25 = vadd.f32 %v1050_v49, %v911_v51  ;;  %v1716_v54 = vmul.f32 %v3086_v23, %v1629_v29  ;;  %v901_v32 = vadd.f32 %v867_v43, %v3690_v26  ;;  %v902_v40 = vadd.f32 %v866_v27, %v3691_v7  ;;  %v3694_v51 = vld [vmem:[#allocation9_spill] sm:$0xff]  ;;  %v3701_v49 = vld [vmem:[#allocation22_spill] sm:$0xff] }
 0x283   : > { %v1223_v44 = vrot.slane %v3692_v2, 3  ;;  %v1715_v53 = vmul.f32 %v3086_v23, %v1616_v48  ;;  %v903_v58 = vadd.f32 %v3695_v30, %v865_v14  ;;  %v3697_v29 = vrot.slane %v3696_v28, 2  ;;  %v3698_v48 = vld [vmem:[#allocation26_spill] sm:$0xff] }
 0x284   : > { %v3098_v31 = vadd.f32 %v1243_v20, %v1104_v25  ;;  %v1731_v52 = vrot.slane %v1716_v54, 7  ;;  %v827_v43 = vrot.slane %v741_v8, 1  ;;  %v1059_v27 = vsel %vm1045_vm1, %v1030_v10, %v1031_v4  ;;  %v3700_v14 = vld [vmem:[#allocation10_spill] sm:$0xff] }
 0x285   : > { %v1058_v57 = vsel %vm1045_vm1, %v1031_v4, %v3697_v29  ;;  %v1060_v20 = vsel %vm1045_vm1, %v3624_v35, %v1030_v10  ;;  %v1416_v25 = vrot.slane %v3698_v48, 4  ;;  %v773_v54 = vpop.permute.xlu1 %772  ;;  %v3625_v7 = vrot.slane %v3700_v14, 4  ;;  %v3117_v29 = vpop.permute.xlu0 %782  ;;  %v3712_v35 = vld [vmem:[#allocation27_spill] sm:$0xff] }
 0x286   : > { %3693 = vst [vmem:[#allocation8_spill] sm:$0xff] %v3098_v31  ;;  %v3114_v26 = vsel %vm1732_vm5, %v1731_v52, %v1715_v53  ;;  %v1094_v28 = vadd.f32 %v1060_v20, %v901_v32  ;;  %v1095_v2 = vadd.f32 %v1059_v27, %v902_v40  ;;  %v843_v30 = vrot.slane %v773_v54, 1  ;;  %v3710_v20 = vld [vmem:[#allocation25_spill] sm:$0xff] }
 0x287   : > { %3699 = vst [vmem:[#allocation6_spill] sm:$0xff] %v3114_v26  ;;  %v1096_v8 = vadd.f32 %v1058_v57, %v903_v58  ;;  %v3702_v4 = vrot.slane %v3701_v49, 3  ;;  %v1252_v10 = vsel %vm1238_vm2, %v1223_v44, %v1224_v50  ;;  %v3703_v48 = vrot.slane %v3694_v51, 3 }
 0x288   : > { %v3704_v32 = vrot.slane %v2744_v16, 1  ;;  %v3705_v57 = vrot.slane %v2836_v22, 1  ;;  %v3706_v52 = vrot.slane %v2758_v47, 1  ;;  %v3707_v49 = vrot.slane %v2858_v6, 1 }
 0x289   : > { %v1251_v23 = vsel %vm1238_vm2, %v1224_v50, %v3702_v4  ;;  %v1253_v53 = vsel %vm1238_vm2, %v3703_v48, %v1223_v44  ;;  %v3708_v16 = vrot.slane %v3683_v37, 4  ;;  %v1446_v22 = vsel %vm1431_vm3, %v3625_v7, %v1416_v25  ;;  %v936_v4 = vpop.permute.xlu1 %935 }
 0x28a   : > { %v874_v40 = vsel %vm852_vm0, %v827_v43, %v3704_v32  ;;  %v875_v58 = vsel %vm852_vm0, %v3705_v57, %v827_v43  ;;  %v858_v50 = vsel %vm852_vm0, %v843_v30, %v3706_v52  ;;  %v859_v44 = vsel %vm852_vm0, %v3707_v49, %v843_v30  ;;  %v3709_v43 = vld [vmem:[#allocation13_spill] sm:$0xff]  ;;  %v3155_v30 = vpop.permute.xlu0 %945  ;;  %v3711_v52 = vld [vmem:[#allocation12_spill] sm:$0xff] }
 0x28b   : > { %v1445_v27 = vsel %vm1431_vm3, %v1416_v25, %v3708_v16  ;;  %v909_v47 = vadd.f32 %v859_v44, %v3709_v43  ;;  %v910_v54 = vadd.f32 %v858_v50, %v3710_v20  ;;  %v1289_v48 = vadd.f32 %v1251_v23, %v1096_v8 }
 0x28c   : > { %v1287_v6 = vadd.f32 %v1253_v53, %v1094_v28  ;;  %v1288_v32 = vadd.f32 %v1252_v10, %v1095_v2  ;;  %v1022_v57 = vrot.slane %v936_v4, 2  ;;  %v893_v49 = vadd.f32 %v875_v58, %v3711_v52 }
 0x28d   : > { %v894_v16 = vadd.f32 %v874_v40, %v3712_v35  ;;  %v1102_v26 = vadd.f32 %v3055_v3, %v909_v47  ;;  %v1103_v31 = vadd.f32 %v3049_v42, %v910_v54  ;;  %v3713_v44 = vrot.slane %v2777_v55, 2  ;;  %v1129_v53 = vpop.permute.xlu1 %1128  ;;  %v3715_v42 = vld [vmem:[#allocation19_spill] sm:$0xff] }
 0x28e   : > { %v1480_v25 = vadd.f32 %v1446_v22, %v1287_v6  ;;  %v1481_v7 = vadd.f32 %v1445_v27, %v1288_v32  ;;  %v3714_v28 = vrot.slane %v2875_v12, 2  ;;  %v1215_v3 = vrot.slane %v1129_v53, 3  ;;  %v3169_v58 = vpop.permute.xlu0 %1138 }
 0x28f   : > { %v1067_v23 = vsel %vm1045_vm1, %v1022_v57, %v3713_v44  ;;  %v1295_v35 = vadd.f32 %v1245_v9, %v1102_v26  ;;  %v1296_v40 = vadd.f32 %v1244_v59, %v1103_v31  ;;  %v3716_v50 = vrot.slane %v3715_v42, 4 }
 0x290   : > { %v1068_v2 = vsel %vm1045_vm1, %v3714_v28, %v1022_v57  ;;  %v1087_v10 = vadd.f32 %v1067_v23, %v894_v16  ;;  %v3717_v55 = vrot.slane %v3683_v37, 4  ;;  %v1519_v12 = vadd.f32 %v2556_v13, %v1480_v25  ;;  %v3722_v25 = vld [vmem:[#allocation34_spill] sm:$0xff]  ;;  %v3723_v23 = vld [vmem:[#allocation37_spill] sm:$0xff] }
 0x291   : > { %v1086_v8 = vadd.f32 %v1068_v2, %v893_v49  ;;  %v1520_v22 = vadd.f32 %v2556_v13, %v1481_v7  ;;  %v3718_v43 = vrot.slane %v2792_v19, 3  ;;  %v3719_v31 = vrot.slane %v2903_v15, 3  ;;  %v1322_v20 = vpop.permute.xlu1 %1321 }
 0x292   : > { %v1444_v27 = vsel %vm1431_vm3, %v3717_v55, %v3716_v50  ;;  %v1513_v54 = vadd.f32 %v2556_v13, %v3089_v5  ;;  %v1408_v4 = vrot.slane %v1322_v20, 4  ;;  %v3189_v6 = vpop.permute.xlu0 %977  ;;  %v1551_v7 = vmax.f32 %v1519_v12, 0.0 }
 0x293   : > { %v1260_v9 = vsel %vm1238_vm2, %v1215_v3, %v3718_v43  ;;  %v1261_v59 = vsel %vm1238_vm2, %v3719_v31, %v1215_v3  ;;  %v1482_v26 = vadd.f32 %v1444_v27, %v1289_v48  ;;  %v1552_v19 = vmax.f32 %v1520_v22, 0.0 }
 0x294   : > { %v1279_v47 = vadd.f32 %v1261_v59, %v1086_v8  ;;  %v1280_v37 = vadd.f32 %v1260_v9, %v1087_v10  ;;  %v3720_v32 = vrot.slane %v2808_v21, 4  ;;  %v3721_v57 = vrot.slane %v2922_v18, 4 }
 0x295   : > { %v1521_v52 = vadd.f32 %v2556_v13, %v1482_v26  ;;  %v1354_v5 = vpop.permute.xlu1 %1353  ;;  %v1522_v44 = vadd.f32 %v2556_v13, %v3722_v25  ;;  %v3626_v28 = vrot.slane %v3723_v23, 4  ;;  %v1545_v2 = vmax.f32 %v1513_v54, 0.0 }
 0x296   : > { %v1453_v15 = vsel %vm1431_vm3, %v1408_v4, %v3720_v32  ;;  %v1454_v48 = vsel %vm1431_vm3, %v3721_v57, %v1408_v4  ;;  %v1424_v21 = vrot.slane %v1354_v5, 4  ;;  %v3203_v8 = vpop.permute.xlu0 %1331  ;;  %v1587_v53 = vmul.f32 %v2609_v38, %v1551_v7 }
 0x297   : > { %v1472_v49 = vadd.f32 %v1454_v48, %v1279_v47  ;;  %v1473_v16 = vadd.f32 %v1453_v15, %v1280_v37  ;;  %v1588_v3 = vmul.f32 %v2614_v61, %v1552_v19  ;;  %v3724_v50 = vrot.slane %v2940_v39, 4 }
 0x298   : > { %v1437_v42 = vsel %vm1431_vm3, %v1424_v21, %v3626_v28  ;;  %v1553_v31 = vmax.f32 %v1521_v52, 0.0  ;;  %v1554_v59 = vmax.f32 %v1522_v44, 0.0  ;;  %v1581_v26 = vmul.f32 %v2642_v46, %v1545_v2 }
 0x299   : > { %v1511_v10 = vadd.f32 %v2556_v13, %v1472_v49  ;;  %v1512_v18 = vadd.f32 %v2556_v13, %v1473_v16  ;;  %v1438_v55 = vsel %vm1431_vm3, %v3724_v50, %v1424_v21  ;;  %v1489_v43 = vadd.f32 %v1437_v42, %v1296_v40  ;;  %v3217_v9 = vpop.permute.xlu1 %1363 }
 0x29a   : > { %v1488_v22 = vadd.f32 %v1438_v55, %v1295_v35  ;;  %v3220_v47 = vpop.permute.xlu0 %1170  ;;  %v1656_v4 = vsel %vm1603_vm4, %v1587_v53, -inf  ;;  %v1657_v35 = vsel %vm1603_vm4, %v1588_v3, -inf  ;;  %v1589_v57 = vmul.f32 %v2642_v46, %v1553_v31  ;;  %v3726_v31 = vld [vmem:[#allocation21_spill] sm:$0xff] }
 0x29b   : > { %v1543_v27 = vmax.f32 %v1511_v10, 0.0  ;;  %v1544_v12 = vmax.f32 %v1512_v18, 0.0  ;;  %v1528_v54 = vadd.f32 %v2556_v13, %v1489_v43  ;;  %v1590_v49 = vmul.f32 %v2673_v63, %v1554_v59 }
 0x29c   : > { %v1527_v39 = vadd.f32 %v2556_v13, %v1488_v22  ;;  %v1633_v25 = vsel %vm1603_vm4, %v1581_v26, -inf  ;;  %v1658_v44 = vmax.f32 %v1656_v4, %v1657_v35  ;;  %v3725_v50 = vrot.slane %v2988_v36, 1 }
 0x29d   : > { %v1579_v37 = vmul.f32 %v2609_v38, %v1543_v27  ;;  %v1580_v20 = vmul.f32 %v2614_v61, %v1544_v12  ;;  %v1560_v32 = vmax.f32 %v1528_v54, 0.0  ;;  %v3230_v15 = vpop.permute.xlu1 %1359  ;;  %v1661_v3 = vsel %vm1603_vm4, %v1590_v49, -inf }
 0x29e   : > { %v1559_v19 = vmax.f32 %v1527_v39, 0.0  ;;  %v3233_v52 = vpop.permute.xlu0 %746  ;;  %v1676_v35 = vrot.slane %v3039_v60, 4  ;;  %v3735_v53 = vrot.slane %v3689_v41, 2 }
 0x29f   : > { %v1630_v40 = vsel %vm1603_vm4, %v1579_v37, -inf  ;;  %v1631_v7 = vsel %vm1603_vm4, %v1580_v20, -inf  ;;  %v1596_v5 = vmul.f32 %v2614_v61, %v1560_v32  ;;  %v830_v46 = vrot.slane %v3233_v52, 1  ;;  %v3741_v52 = vld [vmem:[#allocation17_spill] sm:$0xff] }
 0x2a0   : > { %v1632_v48 = vmax.f32 %v1630_v40, %v1631_v7  ;;  %v1595_v16 = vmul.f32 %v2609_v38, %v1559_v19  ;;  %v1659_v61 = vsel %vm1603_vm4, %v1589_v57, -inf  ;;  %v3727_v37 = vrot.slane %v3032_v33, 2 }
 0x2a1   : > { %v3245_v10 = vsel %vm1603_vm4, %v1596_v5, -inf  ;;  %v753_v18 = vpop.permute.xlu1 %752  ;;  %v1660_v42 = vmax.f32 %v1658_v44, %v1659_v61  ;;  %v872_v55 = vsel %vm852_vm0, %v3725_v50, %v830_v46  ;;  %v3728_v7 = vrot.slane %v3009_v24, 1 }
 0x2a2   : > { %v3239_v2 = vmax.f32 %v1632_v48, %v1633_v25  ;;  %v3242_v21 = vsel %vm1603_vm4, %v1595_v16, -inf  ;;  %v3250_v38 = vpop.permute.xlu0 %778  ;;  %v896_v59 = vadd.f32 %v3726_v31, %v872_v55  ;;  %v3729_v33 = vrot.slane %v2967_v56, 3 }
 0x2a3   : > { %v1662_v12 = vmax.f32 %v1660_v42, %v1661_v3  ;;  %v846_v26 = vrot.slane %v3250_v38, 1  ;;  %v3292_v5 = vmax.f32 %v3039_v60, %v1676_v35  ;;  %v3730_v56 = vrot.slane %v3059_v1, 2 }
 0x2a4   : > { %v832_v42 = vrot.slane %v3091_v17, 1  ;;  %v833_v50 = vrot.slane %v753_v18, 1  ;;  %v1027_v1 = vrot.slane %v3155_v30, 2  ;;  %v1413_v17 = vrot.slane %v3203_v8, 4 }
 0x2a5   : > { %v785_v27 = vpop.permute.xlu1 %784  ;;  %v1663_v39 = vrot.slane %v1662_v12, 4  ;;  %v856_v19 = vsel %vm852_vm0, %v3728_v7, %v846_v26  ;;  %v3732_v7 = vrot.slane %v2364_v45, 1 }
 0x2a6   : > { %v3260_v22 = vpop.permute.xlu0 %941  ;;  %v912_v25 = vadd.f32 %v2424_v62, %v856_v19  ;;  %v849_v31 = vrot.slane %v785_v27, 1  ;;  %v869_v19 = vsel %vm852_vm0, %v832_v42, %v833_v50 }
 0x2a7   : > { %v1025_v43 = vrot.slane %v3260_v22, 2  ;;  %v3287_v48 = vmax.f32 %v1662_v12, %v1663_v39  ;;  %v848_v12 = vrot.slane %v3117_v29, 1  ;;  %v3731_v29 = vrot.slane %v2990_v34, 4 }
 0x2a9   : > { %v1065_v36 = vsel %vm1045_vm1, %v3727_v37, %v1025_v43  ;;  %v948_v20 = vpop.permute.xlu1 %947  ;;  %v1220_v37 = vrot.slane %v3169_v58, 3  ;;  %v853_v34 = vsel %vm852_vm0, %v848_v12, %v849_v31  ;;  %v3761_v11 = vrot.slane %v3287_v48, 2 }
 0x2aa   : > { %v1089_v54 = vadd.f32 %v1065_v36, %v896_v59  ;;  %v3271_v4 = vpop.permute.xlu0 %1134  ;;  %v1043_v36 = vrot.slane %v3189_v6, 2  ;;  %v1028_v39 = vrot.slane %v948_v20, 2  ;;  %v868_v20 = vsel %vm852_vm0, %v833_v50, %v3732_v7  ;;  %v3736_v59 = vld [vmem:[#allocation28_spill] sm:$0xff] }
 0x2ab   : > { %v1218_v40 = vrot.slane %v3271_v4, 3  ;;  %v899_v3 = vadd.f32 %v3736_v59, %v869_v19 }
 0x2ac   : > { %v1061_v7 = vsel %vm1045_vm1, %v1028_v39, %v3735_v53  ;;  %v3739_v53 = vld [vmem:[#allocation29_spill] sm:$0xff] }
 0x2ad   : > { %v1258_v32 = vsel %vm1238_vm2, %v3729_v33, %v1218_v40  ;;  %v1173_v57 = vpop.permute.xlu1 %1172 }
 0x2ae   : > { %v1282_v49 = vadd.f32 %v1258_v32, %v1089_v54  ;;  %v3289_v16 = vpop.permute.xlu0 %973  ;;  %v1236_v54 = vrot.slane %v3220_v47, 3  ;;  %v1237_v30 = vrot.slane %v1173_v57, 3 }
 0x2af   : > { %v1041_v24 = vrot.slane %v3289_v16, 2 }
 0x2b1   : > { %v1049_v44 = vsel %vm1045_vm1, %v3730_v56, %v1041_v24  ;;  %v749_v61 = vpop.permute.xlu1 %748 }
 0x2b2   : > { %v1105_v55 = vadd.f32 %v1049_v44, %v912_v25  ;;  %v3304_v60 = vpop.permute.xlu0 %1327  ;;  %v3733_v25 = vld [vmem:[#allocation11_spill] sm:$0xff] }
 0x2b3   : > { %v1411_v62 = vrot.slane %v3304_v60, 4  ;;  %v3734_v56 = vrot.slane %v3733_v25, 1  ;;  %v3737_v25 = vld [vmem:[#allocation32_spill] sm:$0xff] }
 0x2b4   : > { %v900_v28 = vadd.f32 %v3737_v25, %v868_v20 }
 0x2b5   : > { %v1451_v27 = vsel %vm1431_vm3, %v3731_v29, %v1411_v62  ;;  %v781_v35 = vpop.permute.xlu1 %780  ;;  %v884_v44 = vsel %vm852_vm0, %v849_v31, %v3734_v56  ;;  %v831_v29 = vrot.slane %v749_v61, 1  ;;  %v3738_v61 = vrot.slane %v3011_v0, 3 }
 0x2b6   : > { %v1475_v33 = vadd.f32 %v1451_v27, %v1282_v49  ;;  %v3328_v32 = vpop.permute.xlu0 %1166  ;;  %v1062_v49 = vsel %vm1045_vm1, %v1027_v1, %v1028_v39  ;;  %v847_v27 = vrot.slane %v781_v35, 1  ;;  %v915_v56 = vadd.f32 %v3739_v53, %v853_v34 }
 0x2b7   : > { %v1234_v45 = vrot.slane %v3328_v32, 3  ;;  %v1092_v19 = vadd.f32 %v1062_v49, %v899_v3  ;;  %v1093_v20 = vadd.f32 %v1061_v7, %v900_v28  ;;  %v871_v0 = vsel %vm852_vm0, %v830_v46, %v831_v29 }
 0x2b8   : > { %v1514_v50 = vadd.f32 %v2556_v13, %v1475_v33  ;;  %v3740_v33 = vld [vmem:[#allocation33_spill] sm:$0xff]  ;;  %v870_v57 = vsel %vm852_vm0, %v831_v29, %v832_v42  ;;  %v1239_v28 = vsel %vm1238_vm2, %v1236_v54, %v1237_v30  ;;  %v3742_v3 = vrot.slane %v3741_v52, 3 }
 0x2b9   : > { %v1242_v41 = vsel %vm1238_vm2, %v3738_v61, %v1234_v45  ;;  %v944_v31 = vpop.permute.xlu1 %943  ;;  %v916_v59 = vadd.f32 %v3740_v33, %v884_v44  ;;  %v854_v42 = vsel %vm852_vm0, %v847_v27, %v848_v12  ;;  %v3745_v12 = vld [vmem:[#allocation31_spill] sm:$0xff]  ;;  %v3747_v53 = vrot.slane %v3694_v51, 3 }
 0x2ba   : > { %v1546_v18 = vmax.f32 %v1514_v50, 0.0  ;;  %v3353_v39 = vadd.f32 %v1242_v41, %v1105_v55  ;;  %v1026_v13 = vrot.slane %v944_v31, 2  ;;  %v1141_v35 = vpop.permute.xlu0 %1140  ;;  %v855_v55 = vsel %vm852_vm0, %v846_v26, %v847_v27  ;;  %v3743_v26 = vld [vmem:[#allocation30_spill] sm:$0xff]  ;;  %v3744_v50 = vld [vmem:[#allocation35_spill] sm:$0xff]  ;;  %v3746_v41 = vld [vmem:[#allocation36_spill] sm:$0xff] }
 0x2bb   : > { %v1221_v34 = vrot.slane %v1141_v35, 3  ;;  %v1270_v46 = vsel %vm1238_vm2, %v1237_v30, %v3742_v3  ;;  %v898_v30 = vadd.f32 %v870_v57, %v3744_v50  ;;  %v913_v27 = vadd.f32 %v855_v55, %v3745_v12 }
 0x2bc   : > { %v1582_v25 = vmul.f32 %v2673_v63, %v1546_v18  ;;  %v1064_v63 = vsel %vm1045_vm1, %v1025_v43, %v1026_v13  ;;  %v897_v18 = vadd.f32 %v871_v0, %v3743_v26  ;;  %v1063_v29 = vsel %vm1045_vm1, %v1026_v13, %v1027_v1 }
 0x2bd   : > { %v1137_v38 = vpop.permute.xlu1 %1136  ;;  %v914_v31 = vadd.f32 %v854_v42, %v3746_v41  ;;  %v1254_v35 = vsel %vm1238_vm2, %v1221_v34, %v3747_v53  ;;  %v1255_v1 = vsel %vm1238_vm2, %v1220_v37, %v1221_v34  ;;  %v1091_v33 = vadd.f32 %v1063_v29, %v898_v30 }
 0x2be   : > { %v1635_v44 = vsel %vm1603_vm4, %v1582_v25, -inf  ;;  %v1219_v7 = vrot.slane %v1137_v38, 3  ;;  %v980_v49 = vpop.permute.xlu0 %979  ;;  %v1090_v43 = vadd.f32 %v1064_v63, %v897_v18  ;;  %v3748_v25 = vld [vmem:[#allocation15_spill] sm:$0xff]  ;;  %v1285_v42 = vadd.f32 %v1255_v1, %v1092_v19 }
 0x2bf   : > { %v1636_v61 = vmax.f32 %v3239_v2, %v1635_v44  ;;  %v1044_v22 = vrot.slane %v980_v49, 2  ;;  %v3749_v55 = vrot.slane %v3748_v25, 2  ;;  %v1286_v63 = vadd.f32 %v1254_v35, %v1093_v20 }
 0x2c0   : > { %v1257_v2 = vsel %vm1238_vm2, %v1218_v40, %v1219_v7  ;;  %v1256_v57 = vsel %vm1238_vm2, %v1219_v7, %v1220_v37  ;;  %v3750_v29 = vrot.slane %v3700_v14, 4  ;;  %v3434_v14 = vld [vmem:[%s3544_s2] ss:$0 sm:$0xff] }
 0x2c1   : > { %v1637_v13 = vrot.slane %v1636_v61, 4  ;;  %v1046_v51 = vsel %vm1045_vm1, %v1043_v36, %v1044_v22  ;;  %v976_v0 = vpop.permute.xlu1 %975  ;;  %v1077_v34 = vsel %vm1045_vm1, %v1044_v22, %v3749_v55  ;;  %v1283_v26 = vadd.f32 %v1257_v2, %v1090_v43 }
 0x2c2   : > { %v1108_v4 = vadd.f32 %v1046_v51, %v915_v56  ;;  %v1042_v52 = vrot.slane %v976_v0, 2  ;;  %v1334_v3 = vpop.permute.xlu0 %1333  ;;  %v1109_v18 = vadd.f32 %v1077_v34, %v916_v59  ;;  %v1284_v56 = vadd.f32 %v1256_v57, %v1091_v33  ;;  %v3459_v57 = vld [vmem:[%s3545_s3 + $0x18] sm:$0xff] }
 0x2c3   : > { %v1638_v40 = vmax.f32 %v1636_v61, %v1637_v13  ;;  %v1414_v38 = vrot.slane %v1334_v3, 4  ;;  %v3751_v13 = vrot.slane %v3217_v9, 4 }
 0x2c4   : > { %v1047_v58 = vsel %vm1045_vm1, %v1042_v52, %v1043_v36  ;;  %v1048_v37 = vsel %vm1045_vm1, %v1041_v24, %v1042_v52  ;;  %v3425_v7 = vadd.f32 %v1239_v28, %v1108_v4  ;;  %v1302_v22 = vadd.f32 %v1270_v46, %v1109_v18  ;;  %v1986_v52 = vld [vmem:[%s3545_s3 + $0x10] sm:$0xff] }
 0x2c5   : > { %v1639_v44 = vrot.slane %v1638_v40, 2  ;;  %v1447_v19 = vsel %vm1431_vm3, %v1414_v38, %v3750_v29  ;;  %v1330_v20 = vpop.permute.xlu1 %1329  ;;  %v1106_v59 = vadd.f32 %v1048_v37, %v913_v27  ;;  %v1448_v6 = vsel %vm1431_vm3, %v1413_v17, %v1414_v38  ;;  %v1987_v37 = vld [vmem:[%s3545_s3] sm:$0xff] }
 0x2c6   : > { %v1479_v16 = vadd.f32 %v1447_v19, %v1286_v63  ;;  %v1412_v36 = vrot.slane %v1330_v20, 4  ;;  %v1362_v49 = vpop.permute.xlu0 %1361  ;;  %v1107_v50 = vadd.f32 %v1047_v58, %v914_v31  ;;  %v1478_v30 = vadd.f32 %v1448_v6, %v1285_v42  ;;  %v3755_v20 = vld [vmem:[#allocation8_spill] sm:$0xff] }
 0x2c7   : > { %v1640_v24 = vmax.f32 %v1638_v40, %v1639_v44  ;;  %v1428_v61 = vrot.slane %v1362_v49, 4 }
 0x2c8   : > { %v1518_v28 = vadd.f32 %v3434_v14, %v1479_v16  ;;  %v1449_v12 = vsel %vm1431_vm3, %v1412_v36, %v1413_v17  ;;  %v1450_v27 = vsel %vm1431_vm3, %v1411_v62, %v1412_v36  ;;  %v1517_v31 = vadd.f32 %v3434_v14, %v1478_v30 }
 0x2c9   : > { %v1641_v41 = vrot.slane %v1640_v24, 1  ;;  %v1476_v43 = vadd.f32 %v1450_v27, %v1283_v26  ;;  %v1477_v53 = vadd.f32 %v1449_v12, %v1284_v56  ;;  %v1169_v35 = vpop.permute.xlu1 %1168  ;;  %v1433_v8 = vsel %vm1431_vm3, %v1428_v61, %v3751_v13  ;;  %v1988_v56 = vld [vmem:[%s3545_s3 + $0x8] sm:$0xff] }
 0x2ca   : > { %v1550_v1 = vmax.f32 %v1518_v28, 0.0  ;;  %v3752_v17 = vrot.slane %v3230_v15, 4  ;;  %v1235_v33 = vrot.slane %v1169_v35, 3  ;;  %v1358_v62 = vpop.permute.xlu0 %1357  ;;  %v1549_v2 = vmax.f32 %v1517_v31, 0.0  ;;  %v3758_v31 = vld [vmem:[#allocation18_spill] sm:$0xff] }
 0x2cb   : > { %v1642_v46 = vmax.f32 %v1640_v24, %v1641_v41  ;;  %v1515_v51 = vadd.f32 %v3434_v14, %v1476_v43  ;;  %v1516_v0 = vadd.f32 %v3434_v14, %v1477_v53  ;;  %v1426_v4 = vrot.slane %v1358_v62, 4  ;;  %v3756_v24 = vld [vmem:[#allocation7_spill] sm:$0xff] }
 0x2cc   : > { %v1434_v60 = vsel %vm1431_vm3, %v3752_v17, %v1428_v61  ;;  %v1586_v25 = vmul.f32 %v3459_v57, %v1550_v1  ;;  %v1240_v55 = vsel %vm1238_vm2, %v1235_v33, %v1236_v54  ;;  %v1241_v34 = vsel %vm1238_vm2, %v1234_v45, %v1235_v33 }
 0x2cd   : > { %v1585_v3 = vmul.f32 %v1986_v52, %v1549_v2  ;;  %v1547_v40 = vmax.f32 %v1515_v51, 0.0  ;;  %v1548_v42 = vmax.f32 %v1516_v0, 0.0  ;;  %v1299_v63 = vadd.f32 %v1241_v34, %v1106_v59  ;;  %v1366_v38 = vpop.permute.xlu1 %1365 }
 0x2ce   : > { %v1648_v47 = vsel %vm1603_vm4, %v1586_v25, -inf  ;;  %v1300_v26 = vadd.f32 %v1240_v55, %v1107_v50  ;;  %v3753_v54 = vmov %v3752_v17  ;;  %v3754_v45 = vrot.slane %v3723_v23, 4 }
 0x2cf   : > { %v1435_v32 = vsel %vm1431_vm3, %v1426_v4, %v3753_v54  ;;  %v1646_v58 = vsel %vm1603_vm4, %v1585_v3, -inf  ;;  %v1583_v44 = vmul.f32 %v1987_v37, %v1547_v40  ;;  %v1584_v15 = vmul.f32 %v1988_v56, %v1548_v42 }
 0x2d0   : > { %v1436_v18 = vsel %vm1431_vm3, %v3754_v45, %v1426_v4  ;;  %v1492_v29 = vadd.f32 %v1434_v60, %v1299_v63  ;;  %v1493_v19 = vadd.f32 %v1433_v8, %v1300_v26  ;;  %v1491_v23 = vadd.f32 %v1435_v32, %v3353_v39 }
 0x2d1   : > { %v1490_v59 = vadd.f32 %v1436_v18, %v3755_v20  ;;  %v1430_v6 = vrot.slane %v1366_v38, 4  ;;  %v1643_v16 = vsel %vm1603_vm4, %v1583_v44, -inf  ;;  %v1644_v36 = vsel %vm1603_vm4, %v1584_v15, -inf }
 0x2d2   : > { %v1531_v49 = vadd.f32 %v3434_v14, %v1492_v29  ;;  %v1717_v50 = vmul.f32 %v3756_v24, %v1642_v46  ;;  %v1645_v30 = vmax.f32 %v1643_v16, %v1644_v36  ;;  %v1532_v61 = vadd.f32 %v3434_v14, %v1493_v19  ;;  %v3760_v46 = vld [vmem:[#allocation6_spill] sm:$0xff] }
 0x2d3   : > { %v1529_v28 = vadd.f32 %v3434_v14, %v1490_v59  ;;  %v1530_v12 = vadd.f32 %v3434_v14, %v1491_v23  ;;  %v3757_v41 = vmov %v3751_v13  ;;  %v3759_v43 = vrot.slane %v3758_v31, 4 }
 0x2d4   : > { %v1563_v27 = vmax.f32 %v1531_v49, 0.0  ;;  %v1432_v39 = vsel %vm1431_vm3, %v3757_v41, %v1430_v6  ;;  %v1734_v35 = vrot.slane %v1717_v50, 6  ;;  %v1647_v1 = vmax.f32 %v1645_v30, %v1646_v58 }
 0x2d5   : > { %v1463_v53 = vsel %vm1431_vm3, %v1430_v6, %v3759_v43  ;;  %v1564_v13 = vmax.f32 %v1532_v61, 0.0  ;;  %v1561_v8 = vmax.f32 %v1529_v28, 0.0  ;;  %v1562_v17 = vmax.f32 %v1530_v12, 0.0 }
 0x2d6   : > { %v1599_v60 = vmul.f32 %v1987_v37, %v1563_v27  ;;  %v1494_v33 = vadd.f32 %v1432_v39, %v3425_v7  ;;  %v1495_v62 = vadd.f32 %v1463_v53, %v1302_v22  ;;  %v1736_v9 = vsel %vm1735_vm6, %v1734_v35, %v3760_v46 }
 0x2d7   : > { %v1649_v2 = vmax.f32 %v1647_v1, %v1648_v47  ;;  %v1600_v51 = vmul.f32 %v1988_v56, %v1564_v13  ;;  %v1597_v0 = vmul.f32 %v1986_v52, %v1561_v8  ;;  %v1598_v25 = vmul.f32 %v3459_v57, %v1562_v17 }
 0x2d8   : > { %v1666_v55 = vmax.f32 %v3287_v48, %v3761_v11  ;;  %v1695_v34 = vsel %vm1603_vm4, %v1599_v60, -inf  ;;  %v1533_v4 = vadd.f32 %v3434_v14, %v1494_v33  ;;  %v1534_v3 = vadd.f32 %v3434_v14, %v1495_v62 }
 0x2d9   : > { %v1650_v7 = vrot.slane %v1649_v2, 4  ;;  %v1696_v22 = vsel %vm1603_vm4, %v1600_v51, -inf  ;;  %v1685_v40 = vsel %vm1603_vm4, %v1597_v0, -inf  ;;  %v3762_v42 = vrot.slane %v3292_v5, 2 }
 0x2da   : > { %v3763_v38 = vmax.f32 %v3242_v21, %v3245_v10  ;;  %v1565_v48 = vmax.f32 %v1533_v4, 0.0  ;;  %v1566_v26 = vmax.f32 %v1534_v3, 0.0  ;;  %v1687_v32 = vsel %vm1603_vm4, %v1598_v25, -inf }
 0x2db   : > { %v1679_v63 = vmax.f32 %v3292_v5, %v3762_v42  ;;  %v1651_v54 = vmax.f32 %v1649_v2, %v1650_v7  ;;  %v1697_v45 = vmax.f32 %v1695_v34, %v1696_v22  ;;  %v1667_v37 = vrot.slane %v1666_v55, 1 }
 0x2dc   : > { %v1686_v47 = vmax.f32 %v3763_v38, %v1685_v40  ;;  %v1601_v18 = vmul.f32 %v1986_v52, %v1565_v48  ;;  %v1602_v58 = vmul.f32 %v3459_v57, %v1566_v26 }
 0x2dd   : > { %v1652_v44 = vrot.slane %v1651_v54, 2  ;;  %v1680_v56 = vrot.slane %v1679_v63, 1  ;;  %v1668_v20 = vmax.f32 %v1666_v55, %v1667_v37 }
 0x2de   : > { %v1688_v14 = vmax.f32 %v1686_v47, %v1687_v32  ;;  %v1698_v5 = vsel %vm1603_vm4, %v1601_v18, -inf  ;;  %v1700_v10 = vsel %vm1603_vm4, %v1602_v58, -inf }
 0x2df   : > { %v1699_v29 = vmax.f32 %v1697_v45, %v1698_v5  ;;  %v1653_v19 = vmax.f32 %v1651_v54, %v1652_v44  ;;  %v1681_v6 = vmax.f32 %v1679_v63, %v1680_v56  ;;  %v1719_v57 = vmul.f32 %v3756_v24, %v1668_v20 }
 0x2e0   : > { %v1689_v15 = vrot.slane %v1688_v14, 4 }
 0x2e1   : > { %v1701_v59 = vmax.f32 %v1699_v29, %v1700_v10  ;;  %v1654_v23 = vrot.slane %v1653_v19, 1  ;;  %v1720_v61 = vmul.f32 %v3756_v24, %v1681_v6  ;;  %v1740_v39 = vrot.slane %v1719_v57, 4 }
 0x2e2   : > { %v1690_v21 = vmax.f32 %v1688_v14, %v1689_v15 }
 0x2e3   : > { %v1702_v36 = vrot.slane %v1701_v59, 4  ;;  %v1655_v52 = vmax.f32 %v1653_v19, %v1654_v23  ;;  %v1743_v53 = vrot.slane %v1720_v61, 3 }
 0x2e4   : > { %v1691_v16 = vrot.slane %v1690_v21, 2 }
 0x2e5   : > { %v1703_v50 = vmax.f32 %v1701_v59, %v1702_v36  ;;  %v1718_v30 = vmul.f32 %v3756_v24, %v1655_v52 }
 0x2e6   : > { %v1692_v49 = vmax.f32 %v1690_v21, %v1691_v16 }
 0x2e7   : > { %v1704_v12 = vrot.slane %v1703_v50, 2  ;;  %v1737_v27 = vrot.slane %v1718_v30, 5 }
 0x2e8   : > { %v1693_v28 = vrot.slane %v1692_v49, 1 }
 0x2e9   : > { %v1705_v31 = vmax.f32 %v1703_v50, %v1704_v12  ;;  %v1739_v43 = vsel %vm1738_vm7, %v1737_v27, %v1736_v9  ;;  %v1869_v9 = vld [vmem:[#allocation2] ss:$0 sm:$0xff] }
 0x2ea   : > { %v1694_v41 = vmax.f32 %v1692_v49, %v1693_v28  ;;  %v1742_v1 = vsel %vm1741_vm8, %v1740_v39, %v1739_v43 }
 0x2eb   : > { %v1706_v13 = vrot.slane %v1705_v31, 1  ;;  %v1745_v8 = vsel %vm1744_vm9, %v1743_v53, %v1742_v1 }
 0x2ec   : > { %v1721_v35 = vmul.f32 %v3756_v24, %v1694_v41 }
 0x2ed   : > { %v1707_v60 = vmax.f32 %v1705_v31, %v1706_v13 }
 0x2ee   : > { %v1746_v17 = vrot.slane %v1721_v35, 2 }
 0x2ef   : > { %v1722_v62 = vmul.f32 %v3756_v24, %v1707_v60 }
 0x2f0   : > { %v1748_v33 = vsel %vm1747_vm10, %v1746_v17, %v1745_v8 }
 0x2f1   : > { %v1749_v46 = vrot.slane %v1722_v62, 1 }
 0x2f3   : > { %v1751_v2 = vsel %vm1750_vm11, %v1749_v46, %v1748_v33 }
 0x2f4   : > { %v1753_v51 = vsel %vm1603_vm4, %v1751_v2, 0.0 }
 0x2f5   : > { %1754 = vadd.xlane.f32.xlu0 %v1753_v51 }
 0x37e   : > { %v1755_v0 = vpop.xlane.xlu0 %1754 }
 0x37f   : > { %v1763_v25 = vadd.f32 %v1869_v9, %v1755_v0 }
 0x381   : > { %1765 = vst.msk [vmem:[%s253_s28] sm:$0xff] %vm1764_vm12, %v1763_v25 }
 0x382 PF: > { %s18_s23 = sadd.s32 1, %s1995_s23  }
 0x383   : > { %p15_p5 = scmp.ge.s32.totalorder %s18_s23, 4  }
 0x385   :  { %17 = sbr.rel (!%p15_p5) target bundleno = 3 (0x3), region = 74 }

</bundles_post_ra>
